<compile_context>
chip_gen: v7x
topology: tpu7x:2x2x1
jax: 0.10.0
libtpu: 0.0.40
codegen_flags: <defaults>
</compile_context>

<pallas_src>
import functools
import warnings

import jax
import jax.numpy as jnp
import numpy as np
from jax.experimental import pallas as pl
from jax.experimental.pallas import tpu as pltpu


# ---------------------------------------------------------------------------
# small in-kernel math helpers
# ---------------------------------------------------------------------------
def _gelu_tanh(x):
    # tanh-approximate GELU: tanh runs in the (otherwise idle) EUP slot.
    c = 0.7978845608028654  # sqrt(2/pi)
    return 0.5 * x * (1.0 + jnp.tanh(c * (x + 0.044715 * x * x * x)))


def _layer_norm(x, w, b, eps=1e-5):
    mu = jnp.mean(x, axis=-1, keepdims=True)
    var = jnp.mean((x - mu) ** 2, axis=-1, keepdims=True)
    return (x - mu) * jax.lax.rsqrt(var + eps) * w + b


def _shift_rows(v, k, *, use_roll, roll_matches_numpy):
    """w[t] = v[t - k]; rows whose source crosses a sequence boundary are
    zeroed later by the per-level boundary gate."""
    rows = v.shape[0]
    if use_roll:
        amt = k if roll_matches_numpy else rows - k
        return pltpu.roll(v, amt, axis=0)
    return jnp.concatenate(
        [jnp.zeros((k, v.shape[1]), v.dtype), v[:-k, :]], axis=0)


# ---------------------------------------------------------------------------
# one LRU block (shared by both kernels): in_proj -> scan -> out_proj -> FFN
# ---------------------------------------------------------------------------
def _lru_block_step(cur, mask, level_gates, lamb_levels,
                    w_in, b_in, w_out, b_out, ln1_w, ln1_b,
                    w1, b1, w2, b2, ln2_w, ln2_b,
                    *, hh, use_roll, roll_matches_numpy):
    # complex in_proj (gamma folded into weights/bias); padding rows zeroed
    # once -- equivalent to the torch boundary-gated scan for front-pad masks.
    h = (jnp.dot(cur.astype(jnp.bfloat16), w_in,
                 preferred_element_type=jnp.float32) + b_in) * mask
    hr = h[:, :hh]                                   # (rows, H) real part
    hi = h[:, hh:]                                   # (rows, H) imag part

    # LRU linear recurrence: Kogge-Stone scan, log2(Lp) levels.  hr/hi split
    # -> one sublane roll per half per level, no lane roll (XLU halved).
    for lvl, gate in enumerate(level_gates):
        k = 1 << lvl
        ar, ai = lamb_levels[lvl]                    # (1, H) each
        rr = _shift_rows(hr, k, use_roll=use_roll,
                         roll_matches_numpy=roll_matches_numpy)
        ri = _shift_rows(hi, k, use_roll=use_roll,
                         roll_matches_numpy=roll_matches_numpy)
        hr = hr + gate * (ar * rr - ai * ri)
        hi = hi + gate * (ar * ri + ai * rr)

    # Re(out_proj(h)) + residual + LayerNorm; w_out = [wout_r ; -wout_i] fused.
    hcat = jnp.concatenate([hr, hi], axis=1).astype(jnp.bfloat16)
    y = jnp.dot(hcat, w_out, preferred_element_type=jnp.float32) + b_out
    z = _layer_norm(y + cur, ln1_w, ln1_b)

    # PositionwiseFeedForward (dropout = identity in eval), tanh-GELU on EUP.
    f = jnp.dot(z.astype(jnp.bfloat16), w1,
                preferred_element_type=jnp.float32) + b1
    f = _gelu_tanh(f)
    f = jnp.dot(f.astype(jnp.bfloat16), w2,
                preferred_element_type=jnp.float32) + b2
    return _layer_norm(f + z, ln2_w, ln2_b)


def _mask_and_gates(rows, lp, pad, n_levels):
    # Row position within each length-Lp sequence, computed in-kernel (no
    # narrow HBM input streams).  gate_j[r] = 1 iff (r mod Lp) >= 2**j.
    pos = jax.lax.broadcasted_iota(jnp.int32, (rows, 1), 0) & (lp - 1)
    mask = (pos >= pad).astype(jnp.float32)
    gates = [(pos >= (1 << j)).astype(jnp.float32) for j in range(n_levels)]
    return mask, gates


# ---------------------------------------------------------------------------
# kernel A: all blocks' weights resident in VMEM (v5e/v6e, or small models)
# ---------------------------------------------------------------------------
def lru_resident_kernel(x_ref, w_in_ref, b_in_ref, la_ref, lb_ref,
                        w_out_ref, bo_ref, ln1w_ref, ln1b_ref,
                        w1_ref, b1_ref, w2_ref, b2_ref, ln2w_ref, ln2b_ref,
                        out_ref, *, num_blocks, lp, pad,
                        use_roll, roll_matches_numpy):
    rows = out_ref.shape[0]
    hh = la_ref.shape[-1]
    n_levels = la_ref.shape[1]
    mask, level_gates = _mask_and_gates(rows, lp, pad, n_levels)

    cur = x_ref[...]
    for blk in range(num_blocks):
        lamb_levels = [(la_ref[blk, j:j + 1, :], lb_ref[blk, j:j + 1, :])
                       for j in range(n_levels)]
        cur = _lru_block_step(
            cur, mask, level_gates, lamb_levels,
            w_in_ref[blk], b_in_ref[blk], w_out_ref[blk], bo_ref[blk],
            ln1w_ref[blk], ln1b_ref[blk], w1_ref[blk], b1_ref[blk],
            w2_ref[blk], b2_ref[blk], ln2w_ref[blk], ln2b_ref[blk],
            hh=hh, use_roll=use_roll, roll_matches_numpy=roll_matches_numpy)
    out_ref[...] = cur


# ---------------------------------------------------------------------------
# kernel B: blocks on an inner "arbitrary" grid axis, weights streamed per
# block while the activation stays resident in the output block (v7x path)
# ---------------------------------------------------------------------------
def lru_stream_kernel(x_ref, w_in_ref, b_in_ref, la_ref, lb_ref,
                      w_out_ref, bo_ref, ln1w_ref, ln1b_ref,
                      w1_ref, b1_ref, w2_ref, b2_ref, ln2w_ref, ln2b_ref,
                      out_ref, *, lp, pad, use_roll, roll_matches_numpy):
    rows = out_ref.shape[0]
    hh = la_ref.shape[-1]
    n_levels = la_ref.shape[1]
    mask, level_gates = _mask_and_gates(rows, lp, pad, n_levels)

    @pl.when(pl.program_id(1) == 0)
    def _():                       # seed the resident activation with x
        out_ref[...] = x_ref[...]

    cur = out_ref[...]
    lamb_levels = [(la_ref[0, j:j + 1, :], lb_ref[0, j:j + 1, :])
                   for j in range(n_levels)]
    out_ref[...] = _lru_block_step(
        cur, mask, level_gates, lamb_levels,
        w_in_ref[0], b_in_ref[0], w_out_ref[0], bo_ref[0],
        ln1w_ref[0], ln1b_ref[0], w1_ref[0], b1_ref[0],
        w2_ref[0], b2_ref[0], ln2w_ref[0], ln2b_ref[0],
        hh=hh, use_roll=use_roll, roll_matches_numpy=roll_matches_numpy)


# ---------------------------------------------------------------------------
# pltpu.roll availability / shift-convention probe (portability insurance)
# ---------------------------------------------------------------------------
@functools.lru_cache(maxsize=None)
def _roll_mode():
    """Returns (roll_available, roll_matches_numpy)."""
    def k(x_ref, o_ref):
        o_ref[...] = pltpu.roll(x_ref[...], 1, axis=0)

    x = jnp.broadcast_to(jnp.arange(8, dtype=jnp.float32)[:, None], (8, 128))
    vmem = pl.BlockSpec(memory_space=pltpu.MemorySpace.VMEM)
    try:
        y = pl.pallas_call(
            k, out_shape=jax.ShapeDtypeStruct((8, 128), jnp.float32),
            in_specs=[vmem], out_specs=vmem)(x)
        y0 = float(np.asarray(jax.block_until_ready(y))[1, 0])
        return True, (y0 == 0.0)     # np.roll convention: out[t] = in[t - 1]
    except Exception as e:           # pragma: no cover
        warnings.warn(
            f"pltpu.roll probe failed ({e!r}); using concat-based shifts")
        return False, True


# ---------------------------------------------------------------------------
# VMEM / tiling heuristics (per TPU generation)
# ---------------------------------------------------------------------------
def _vmem_limit_bytes():
    cap = 128 * 1024 * 1024
    try:
        cap = int(getattr(pltpu.get_tpu_info(), "vmem_capacity_bytes", cap))
    except Exception:
        pass
    # ~75% of physical per-TC VMEM: ~48 MiB on v7x (64 MiB), ~96 MiB on
    # v5e/v6e (128 MiB), capped to leave headroom for double buffers.
    return min(cap * 3 // 4, 112 * 1024 * 1024)


def _pick_seqs_per_tile(B, lp, D, vmem_limit):
    """Largest sublane-aligned row tile that fits the scan working set, while
    preferring >=2 grid steps so megacore (v7x) has parallel work."""
    H = 2 * D
    per_row_bytes = 4 * (6 * H + 6 * D)        # hr/hi/rolled/carry + x/out/ffn
    rows_target = max(8, min(2048, (vmem_limit // 3) // max(per_row_bytes, 1)))
    divisors = [s for s in range(1, B + 1) if B % s == 0]
    aligned = [s for s in divisors if (s * lp) % 8 == 0]
    fitting = [s for s in aligned if s * lp <= rows_target]
    multi = [s for s in fitting if B // s >= 2]
    if multi:
        return max(multi)
    if fitting:
        return max(fitting)
    if aligned:      # sequences longer than the target: one sequence per tile
        return min(aligned)
    return B         # tiny Lp: single full tile (concat-shift fallback kicks in)


_WEIGHT_NAMES = ("w_in", "b_in", "lamb_a", "lamb_b", "w_out", "b_out",
                 "ln1_w", "ln1_b", "w1", "b1", "w2", "b2", "ln2_w", "ln2_b")


# ---------------------------------------------------------------------------
# pallas_call wrapper
# ---------------------------------------------------------------------------
def lru_stack_forward(x_flat, kp, *, lp, pad, seqs_per_tile, stream_blocks,
                      use_roll, roll_matches_numpy, vmem_limit):
    BL, D = x_flat.shape
    assert lp >= 2 and (lp & (lp - 1)) == 0, "padded length must be a power of 2"
    num_blocks = kp["w_in"].shape[0]
    n_levels = kp["lamb_a"].shape[1]
    H = 2 * D

    rows_tile = seqs_per_tile * lp
    assert BL % rows_tile == 0
    n_tiles = BL // rows_tile
    use_roll = use_roll and (rows_tile % 8 == 0)

    weights = [kp[n] for n in _WEIGHT_NAMES]
    weight_bytes = sum(int(np.prod(w.shape)) * w.dtype.itemsize for w in weights)

    flops = (2 * BL * num_blocks * (D * 2 * H + 2 * H * D + 8 * D * D)
             + BL * num_blocks * n_levels * 16 * H)
    cost = pl.CostEstimate(
        flops=int(flops),
        transcendentals=int(BL * num_blocks * (4 * D + 4)),
        bytes_accessed=int(2 * BL * D * 4
                           + weight_bytes * (n_tiles if stream_blocks else 1)))

    if stream_blocks:
        # grid = (batch tiles, blocks); weights streamed per block, activation
        # stays resident in the output block across the "arbitrary" axis.
        row = pl.BlockSpec((rows_tile, D), lambda i, j: (i, 0))

        def wspec(a):
            nz = a.ndim - 1
            return pl.BlockSpec((1,) + a.shape[1:],
                                lambda i, j, _n=nz: (j,) + (0,) * _n)

        kernel = functools.partial(
            lru_stream_kernel, lp=lp, pad=pad,
            use_roll=use_roll, roll_matches_numpy=roll_matches_numpy)
        grid = (n_tiles, num_blocks)
        dims = ("parallel", "arbitrary")
    else:
        # all blocks' weights resident; single batch-tile grid axis.
        row = pl.BlockSpec((rows_tile, D), lambda i: (i, 0))

        def wspec(a):
            zeros = (0,) * a.ndim
            return pl.BlockSpec(a.shape, lambda i, _z=zeros: _z)

        kernel = functools.partial(
            lru_resident_kernel, num_blocks=num_blocks, lp=lp, pad=pad,
            use_roll=use_roll, roll_matches_numpy=roll_matches_numpy)
        grid = (n_tiles,)
        dims = ("parallel",)

    return pl.pallas_call(
        kernel,
        grid=grid,
        out_shape=jax.ShapeDtypeStruct((BL, D), jnp.float32),
        in_specs=[row] + [wspec(a) for a in weights],
        out_specs=row,
        cost_estimate=cost,
        compiler_params=pltpu.CompilerParams(
            dimension_semantics=dims,
            vmem_limit_bytes=int(vmem_limit)),
    )(x_flat, *weights)


# ---------------------------------------------------------------------------
# parameter preparation (host side): fold gamma, fuse re/im, lamb powers, bf16
# ---------------------------------------------------------------------------
def prepare_stacked_params(params_list, lp):
    n_levels = lp.bit_length() - 1
    w_in, b_in, la, lb, w_out, b_out = [], [], [], [], [], []
    ln1w, ln1b, w1, b1, w2, b2, ln2w, ln2b = [], [], [], [], [], [], [], []
    for p in params_list:
        g = p["gamma"]                                                  # (H,)
        w_in.append(jnp.concatenate([p["win_r"] * g, p["win_i"] * g], axis=1))
        b_in.append(jnp.concatenate([p["bin_r"] * g, p["bin_i"] * g])[None, :])
        # lamb^(2^j), j = 0..log2(Lp)-1, real / imag tables (n_levels, H)
        cr, ci = p["lamb_r"], p["lamb_i"]
        ar, ai = [], []
        for _ in range(n_levels):
            ar.append(cr)
            ai.append(ci)
            cr, ci = cr * cr - ci * ci, 2.0 * cr * ci
        la.append(jnp.stack(ar))
        lb.append(jnp.stack(ai))
        w_out.append(jnp.concatenate([p["wout_r"], -p["wout_i"]], axis=0))
        b_out.append(p["bout_r"][None, :])
        ln1w.append(p["ln1_w"][None, :]); ln1b.append(p["ln1_b"][None, :])
        w1.append(p["w1"]); b1.append(p["b1"][None, :])
        w2.append(p["w2"]); b2.append(p["b2"][None, :])
        ln2w.append(p["ln2_w"][None, :]); ln2b.append(p["ln2_b"][None, :])

    f32, bf16 = jnp.float32, jnp.bfloat16
    return dict(
        w_in=jnp.stack(w_in).astype(bf16), b_in=jnp.stack(b_in).astype(f32),
        lamb_a=jnp.stack(la).astype(f32), lamb_b=jnp.stack(lb).astype(f32),
        w_out=jnp.stack(w_out).astype(bf16), b_out=jnp.stack(b_out).astype(f32),
        ln1_w=jnp.stack(ln1w).astype(f32), ln1_b=jnp.stack(ln1b).astype(f32),
        w1=jnp.stack(w1).astype(bf16), b1=jnp.stack(b1).astype(f32),
        w2=jnp.stack(w2).astype(bf16), b2=jnp.stack(b2).astype(f32),
        ln2_w=jnp.stack(ln2w).astype(f32), ln2_b=jnp.stack(ln2b).astype(f32),
    )


def init_block_params(key, d_model, r_min=0.8, r_max=0.99):
    D = d_model
    H = 2 * D
    F4 = 4 * D
    ks = jax.random.split(key, 11)

    u1 = jax.random.uniform(ks[0], (H,))
    u2 = jax.random.uniform(ks[1], (H,))
    nu_log = jnp.log(-0.5 * jnp.log(u1 * (r_max ** 2 - r_min ** 2) + r_min ** 2))
    theta_log = jnp.log(u2 * 2.0 * np.pi)
    nu = jnp.exp(nu_log)
    theta = jnp.exp(theta_log)
    mod = jnp.exp(-nu)
    lamb_r = mod * jnp.cos(theta)
    lamb_i = mod * jnp.sin(theta)
    gamma = jnp.sqrt(1.0 - mod ** 2)          # = exp(gamma_log)

    def lin(k, fan_in, shape):
        bound = 1.0 / np.sqrt(fan_in)
        return jax.random.uniform(k, shape, minval=-bound, maxval=bound)

    params = dict(
        # complex in_proj, stored pre-transposed as (in, out)
        win_r=lin(ks[2], D, (D, H)), win_i=lin(ks[3], D, (D, H)),
        bin_r=lin(ks[4], D, (H,)), bin_i=lin(ks[5], D, (H,)),
        gamma=gamma, lamb_r=lamb_r, lamb_i=lamb_i,
        # complex out_proj (only real part of its bias reaches .real output)
        wout_r=lin(ks[6], H, (H, D)), wout_i=lin(ks[7], H, (H, D)),
        bout_r=lin(ks[8], H, (D,)),
        ln1_w=jnp.ones((D,)), ln1_b=jnp.zeros((D,)),
        # PositionwiseFeedForward
        w1=lin(ks[9], D, (D, F4)), b1=jnp.zeros((F4,)),
        w2=lin(ks[10], F4, (F4, D)), b2=jnp.zeros((D,)),
        ln2_w=jnp.ones((D,)), ln2_b=jnp.zeros((D,)),
    )
    return {k: v.astype(jnp.float32) for k, v in params.items()}


def lru_model_forward(x, params_list, *, seqs_per_tile=None, force_stream=None):
    """LRUModel.forward with h=None, mask=None (eval mode, L > 1)."""
    B, L, D = x.shape
    # TODO(synk): decode path (prev-state h, L == 1) is not implemented.
    assert L > 1, "decode path (prev-state h, L == 1) is not implemented"
    num_blocks = len(params_list)
    lp = 1 << int(np.ceil(np.log2(L)))
    pad = lp - L
    x_p = jnp.pad(x, ((0, 0), (pad, 0), (0, 0)))               # front-pad seq
    x_flat = x_p.reshape(B * lp, D)

    kp = prepare_stacked_params(params_list, lp)
    vmem_limit = _vmem_limit_bytes()
    if seqs_per_tile is None:
        seqs_per_tile = _pick_seqs_per_tile(B, lp, D, vmem_limit)

    weight_bytes = sum(int(np.prod(v.shape)) * v.dtype.itemsize
                       for v in kp.values())
    if force_stream is None:
        # stream blocks when the (double-buffered) resident weight footprint
        # would eat a large share of the per-generation VMEM budget (v7x case).
        stream_blocks = num_blocks > 1 and 2 * weight_bytes > vmem_limit // 2
    else:
        stream_blocks = bool(force_stream) and num_blocks > 1

    use_roll, roll_np = _roll_mode()
    out_flat = lru_stack_forward(
        x_flat, kp, lp=lp, pad=pad, seqs_per_tile=seqs_per_tile,
        stream_blocks=stream_blocks, use_roll=use_roll,
        roll_matches_numpy=roll_np, vmem_limit=vmem_limit)

    out = out_flat.reshape(B, lp, D)[:, -L:]
    h_new = [None] * num_blocks     # `now` is None when L > 1 and prev is None
    return out, h_new


# ---------------------------------------------------------------------------
# pure-JAX reference (faithful to the torch module, f32 / complex64)
# ---------------------------------------------------------------------------
def _ln_ref(x, w, b, eps=1e-5):
    mu = jnp.mean(x, axis=-1, keepdims=True)
    var = jnp.mean((x - mu) ** 2, axis=-1, keepdims=True)
    return (x - mu) * jax.lax.rsqrt(var + eps) * w + b


def _reference_block(x, mask, p):
    B, Lp, D = x.shape
    H = 2 * D
    w_in = p["win_r"] + 1j * p["win_i"]
    b_in = p["bin_r"] + 1j * p["bin_i"]
    h = (x.astype(jnp.complex64) @ w_in + b_in) * p["gamma"]
    lamb = (p["lamb_r"] + 1j * p["lamb_i"])[None, :]
    n_levels = Lp.bit_length() - 1
    for i in range(1, n_levels + 1):
        l = 2 ** i
        hs = h.reshape(B * Lp // l, l, H)
        ms = mask.reshape(B * Lp // l, l)
        h1, h2 = hs[:, : l // 2], hs[:, l // 2:]
        if i > 1:
            lamb = jnp.concatenate([lamb, lamb * lamb[-1]], axis=0)
        h2 = h2 + lamb * h1[:, -1:] * ms[:, l // 2 - 1: l // 2, None]
        h = jnp.concatenate([h1, h2], axis=1).reshape(B, Lp, H)
    y = (h @ (p["wout_r"] + 1j * p["wout_i"])).real + p["bout_r"]
    z = _ln_ref(y + x, p["ln1_w"], p["ln1_b"])
    f = z @ p["w1"] + p["b1"]
    f = 0.5 * f * (1.0 + jax.lax.erf(f * (1.0 / np.sqrt(2.0))))   # exact GELU
    f = f @ p["w2"] + p["b2"]
    return _ln_ref(f + z, p["ln2_w"], p["ln2_b"])


def _reference_forward(x, params_list):
    B, L, D = x.shape
    lp = 2 ** int(np.ceil(np.log2(L)))
    pad = lp - L
    xp = jnp.pad(x, ((0, 0), (pad, 0), (0, 0)))
    mask = jnp.pad(jnp.ones((B, L), jnp.float32), ((0, 0), (pad, 0)))
    for p in params_list:
        xp = _reference_block(xp, mask, p)
    return xp[:, -L:]


if __name__ == "__main__":
    B, L, D = 2, 6, 32          # batch, seq_len, bert_hidden_units
    num_blocks = 2              # bert_num_blocks

    key = jax.random.PRNGKey(0)
    kx, kparams = jax.random.split(key)
    x = jax.random.normal(kx, (B, L, D), dtype=jnp.float32)
    params_list = [init_block_params(k, D)
                   for k in jax.random.split(kparams, num_blocks)]

    ref = _reference_forward(x, params_list)

    # auto path (weights fit VMEM -> resident kernel, batch-tile grid)
    out, h_new = lru_model_forward(x, params_list)
    out = jax.block_until_ready(out)
    assert out.shape == (B, L, D), out.shape
    assert h_new == [None] * num_blocks
    np.testing.assert_allclose(np.asarray(out), np.asarray(ref),
                               rtol=2e-2, atol=1e-1)

    # block-streaming path (the v7x weight-budget kernel), forced for coverage
    out_s, _ = lru_model_forward(x, params_list, force_stream=True)
    out_s = jax.block_until_ready(out_s)
    np.testing.assert_allclose(np.asarray(out_s), np.asarray(ref),
                               rtol=2e-2, atol=1e-1)

    print("KERNEL_OK")
</pallas_src>

<mosaic_0001>
module attributes {stable_mosaic.version = 11 : i64} {
  func.func @k(%arg0: memref<8x128xf32, #tpu.memory_space<vmem>>, %arg1: memref<8x128xf32, #tpu.memory_space<vmem>>) attributes {dimension_semantics = [], scalar_prefetch = 0 : i64, scratch_operands = 0 : i64, tpu.core_type = #tpu.core_type<tc>} {
    %c0 = arith.constant 0 : index
    %c0_0 = arith.constant 0 : index
    %0 = vector.load %arg0[%c0, %c0_0] : memref<8x128xf32, #tpu.memory_space<vmem>>, vector<8x128xf32>
    %c1_i32 = arith.constant 1 : i32
    %1 = tpu.dynamic_rotate %0 by %c1_i32 dim 0 : vector<8x128xf32>, i32 -> vector<8x128xf32>
    %c0_1 = arith.constant 0 : index
    %c0_2 = arith.constant 0 : index
    %2 = vector.load %arg1[%c0_1, %c0_2] : memref<8x128xf32, #tpu.memory_space<vmem>>, vector<8x128xf32>
    tpu.vector_store %arg1[%c0_1, %c0_2], %1 {strides = array<i32>} : memref<8x128xf32, #tpu.memory_space<vmem>>, vector<8x128xf32>,
    return
  }
}

module attributes {stable_mosaic.version = 11 : i64} {
  func.func @lru_resident_kernel(%arg0: i32, %arg1: memref<8x32xf32, #tpu.memory_space<vmem>>, %arg2: memref<2x32x128xbf16, #tpu.memory_space<vmem>>, %arg3: memref<2x1x128xf32, #tpu.memory_space<vmem>>, %arg4: memref<2x3x64xf32, #tpu.memory_space<vmem>>, %arg5: memref<2x3x64xf32, #tpu.memory_space<vmem>>, %arg6: memref<2x128x32xbf16, #tpu.memory_space<vmem>>, %arg7: memref<2x1x32xf32, #tpu.memory_space<vmem>>, %arg8: memref<2x1x32xf32, #tpu.memory_space<vmem>>, %arg9: memref<2x1x32xf32, #tpu.memory_space<vmem>>, %arg10: memref<2x32x128xbf16, #tpu.memory_space<vmem>>, %arg11: memref<2x1x128xf32, #tpu.memory_space<vmem>>, %arg12: memref<2x128x32xbf16, #tpu.memory_space<vmem>>, %arg13: memref<2x1x32xf32, #tpu.memory_space<vmem>>, %arg14: memref<2x1x32xf32, #tpu.memory_space<vmem>>, %arg15: memref<2x1x32xf32, #tpu.memory_space<vmem>>, %arg16: memref<8x32xf32, #tpu.memory_space<vmem>>) attributes {dimension_semantics = [#tpu.dimension_semantics<parallel>], iteration_bounds = array<i64: 2>, scalar_prefetch = 0 : i64, scratch_operands = 0 : i64, tpu.core_type = #tpu.core_type<tc>, window_params = [{transform_indices = @transform_0, window_bounds = array<i64: 8, 32>}, {pipeline_mode = #tpu.pipeline_mode<synchronous>, transform_indices = @transform_1, window_bounds = array<i64: 2, 32, 128>}, {pipeline_mode = #tpu.pipeline_mode<synchronous>, transform_indices = @transform_2, window_bounds = array<i64: 2, 1, 128>}, {pipeline_mode = #tpu.pipeline_mode<synchronous>, transform_indices = @transform_3, window_bounds = array<i64: 2, 3, 64>}, {pipeline_mode = #tpu.pipeline_mode<synchronous>, transform_indices = @transform_4, window_bounds = array<i64: 2, 3, 64>}, {pipeline_mode = #tpu.pipeline_mode<synchronous>, transform_indices = @transform_5, window_bounds = array<i64: 2, 128, 32>}, {pipeline_mode = #tpu.pipeline_mode<synchronous>, transform_indices = @transform_6, window_bounds = array<i64: 2, 1, 32>}, {pipeline_mode = #tpu.pipeline_mode<synchronous>, transform_indices = @transform_7, window_bounds = array<i64: 2, 1, 32>}, {pipeline_mode = #tpu.pipeline_mode<synchronous>, transform_indices = @transform_8, window_bounds = array<i64: 2, 1, 32>}, {pipeline_mode = #tpu.pipeline_mode<synchronous>, transform_indices = @transform_9, window_bounds = array<i64: 2, 32, 128>}, {pipeline_mode = #tpu.pipeline_mode<synchronous>, transform_indices = @transform_10, window_bounds = array<i64: 2, 1, 128>}, {pipeline_mode = #tpu.pipeline_mode<synchronous>, transform_indices = @transform_11, window_bounds = array<i64: 2, 128, 32>}, {pipeline_mode = #tpu.pipeline_mode<synchronous>, transform_indices = @transform_12, window_bounds = array<i64: 2, 1, 32>}, {pipeline_mode = #tpu.pipeline_mode<synchronous>, transform_indices = @transform_13, window_bounds = array<i64: 2, 1, 32>}, {pipeline_mode = #tpu.pipeline_mode<synchronous>, transform_indices = @transform_14, window_bounds = array<i64: 2, 1, 32>}, {transform_indices = @transform_15, window_bounds = array<i64: 8, 32>}]} {
    %0 = tpu.iota {dimensions = array<i32: 0>} : vector<8x1xi32>
    %c7_i32 = arith.constant 7 : i32
    %1 = vector.broadcast %c7_i32 : i32 to vector<8x1xi32>
    %2 = arith.andi %0, %1 : vector<8x1xi32>
    %c2_i32 = arith.constant 2 : i32
    %3 = vector.broadcast %c2_i32 : i32 to vector<8x1xi32>
    %4 = arith.cmpi sge, %2, %3 : vector<8x1xi32>
    %5 = arith.extui %4 : vector<8x1xi1> to vector<8x1xi32>
    %6 = arith.sitofp %5 : vector<8x1xi32> to vector<8x1xf32>
    %c1_i32 = arith.constant 1 : i32
    %7 = vector.broadcast %c1_i32 : i32 to vector<8x1xi32>
    %8 = arith.cmpi sge, %2, %7 : vector<8x1xi32>
    %9 = arith.extui %8 : vector<8x1xi1> to vector<8x1xi32>
    %10 = arith.sitofp %9 : vector<8x1xi32> to vector<8x1xf32>
    %c2_i32_0 = arith.constant 2 : i32
    %11 = vector.broadcast %c2_i32_0 : i32 to vector<8x1xi32>
    %12 = arith.cmpi sge, %2, %11 : vector<8x1xi32>
    %13 = arith.extui %12 : vector<8x1xi1> to vector<8x1xi32>
    %14 = arith.sitofp %13 : vector<8x1xi32> to vector<8x1xf32>
    %c4_i32 = arith.constant 4 : i32
    %15 = vector.broadcast %c4_i32 : i32 to vector<8x1xi32>
    %16 = arith.cmpi sge, %2, %15 : vector<8x1xi32>
    %17 = arith.extui %16 : vector<8x1xi1> to vector<8x1xi32>
    %18 = arith.sitofp %17 : vector<8x1xi32> to vector<8x1xf32>
    %c0 = arith.constant 0 : index
    %c0_1 = arith.constant 0 : index
    %19 = vector.load %arg1[%c0, %c0_1] : memref<8x32xf32, #tpu.memory_space<vmem>>, vector<8x32xf32>
    %c0_2 = arith.constant 0 : index
    %c0_3 = arith.constant 0 : index
    %c0_4 = arith.constant 0 : index
    %20 = vector.load %arg4[%c0_2, %c0_3, %c0_4] : memref<2x3x64xf32, #tpu.memory_space<vmem>>, vector<1x1x64xf32>
    %21 = vector.shape_cast %20 : vector<1x1x64xf32> to vector<1x64xf32>
    %c0_5 = arith.constant 0 : index
    %c0_6 = arith.constant 0 : index
    %c0_7 = arith.constant 0 : index
    %22 = vector.load %arg5[%c0_5, %c0_6, %c0_7] : memref<2x3x64xf32, #tpu.memory_space<vmem>>, vector<1x1x64xf32>
    %23 = vector.shape_cast %22 : vector<1x1x64xf32> to vector<1x64xf32>
    %c0_8 = arith.constant 0 : index
    %c1 = arith.constant 1 : index
    %c0_9 = arith.constant 0 : index
    %24 = vector.load %arg4[%c0_8, %c1, %c0_9] : memref<2x3x64xf32, #tpu.memory_space<vmem>>, vector<1x1x64xf32>
    %25 = vector.shape_cast %24 : vector<1x1x64xf32> to vector<1x64xf32>
    %c0_10 = arith.constant 0 : index
    %c1_11 = arith.constant 1 : index
    %c0_12 = arith.constant 0 : index
    %26 = vector.load %arg5[%c0_10, %c1_11, %c0_12] : memref<2x3x64xf32, #tpu.memory_space<vmem>>, vector<1x1x64xf32>
    %27 = vector.shape_cast %26 : vector<1x1x64xf32> to vector<1x64xf32>
    %c0_13 = arith.constant 0 : index
    %c2 = arith.constant 2 : index
    %c0_14 = arith.constant 0 : index
    %28 = vector.load %arg4[%c0_13, %c2, %c0_14] : memref<2x3x64xf32, #tpu.memory_space<vmem>>, vector<1x1x64xf32>
    %29 = vector.shape_cast %28 : vector<1x1x64xf32> to vector<1x64xf32>
    %c0_15 = arith.constant 0 : index
    %c2_16 = arith.constant 2 : index
    %c0_17 = arith.constant 0 : index
    %30 = vector.load %arg5[%c0_15, %c2_16, %c0_17] : memref<2x3x64xf32, #tpu.memory_space<vmem>>, vector<1x1x64xf32>
    %31 = vector.shape_cast %30 : vector<1x1x64xf32> to vector<1x64xf32>
    %c0_18 = arith.constant 0 : index
    %c0_19 = arith.constant 0 : index
    %c0_20 = arith.constant 0 : index
    %32 = vector.load %arg2[%c0_18, %c0_19, %c0_20] : memref<2x32x128xbf16, #tpu.memory_space<vmem>>, vector<1x32x128xbf16>
    %33 = vector.shape_cast %32 : vector<1x32x128xbf16> to vector<32x128xbf16>
    %c0_21 = arith.constant 0 : index
    %c0_22 = arith.constant 0 : index
    %c0_23 = arith.constant 0 : index
    %34 = vector.load %arg3[%c0_21, %c0_22, %c0_23] : memref<2x1x128xf32, #tpu.memory_space<vmem>>, vector<1x1x128xf32>
    %35 = vector.shape_cast %34 : vector<1x1x128xf32> to vector<1x128xf32>
    %c0_24 = arith.constant 0 : index
    %c0_25 = arith.constant 0 : index
    %c0_26 = arith.constant 0 : index
    %36 = vector.load %arg6[%c0_24, %c0_25, %c0_26] : memref<2x128x32xbf16, #tpu.memory_space<vmem>>, vector<1x128x32xbf16>
    %37 = vector.shape_cast %36 : vector<1x128x32xbf16> to vector<128x32xbf16>
    %c0_27 = arith.constant 0 : index
    %c0_28 = arith.constant 0 : index
    %c0_29 = arith.constant 0 : index
    %38 = vector.load %arg7[%c0_27, %c0_28, %c0_29] : memref<2x1x32xf32, #tpu.memory_space<vmem>>, vector<1x1x32xf32>
    %39 = vector.shape_cast %38 : vector<1x1x32xf32> to vector<1x32xf32>
    %c0_30 = arith.constant 0 : index
    %c0_31 = arith.constant 0 : index
    %c0_32 = arith.constant 0 : index
    %40 = vector.load %arg8[%c0_30, %c0_31, %c0_32] : memref<2x1x32xf32, #tpu.memory_space<vmem>>, vector<1x1x32xf32>
    %41 = vector.shape_cast %40 : vector<1x1x32xf32> to vector<1x32xf32>
    %c0_33 = arith.constant 0 : index
    %c0_34 = arith.constant 0 : index
    %c0_35 = arith.constant 0 : index
    %42 = vector.load %arg9[%c0_33, %c0_34, %c0_35] : memref<2x1x32xf32, #tpu.memory_space<vmem>>, vector<1x1x32xf32>
    %43 = vector.shape_cast %42 : vector<1x1x32xf32> to vector<1x32xf32>
    %c0_36 = arith.constant 0 : index
    %c0_37 = arith.constant 0 : index
    %c0_38 = arith.constant 0 : index
    %44 = vector.load %arg10[%c0_36, %c0_37, %c0_38] : memref<2x32x128xbf16, #tpu.memory_space<vmem>>, vector<1x32x128xbf16>
    %45 = vector.shape_cast %44 : vector<1x32x128xbf16> to vector<32x128xbf16>
    %c0_39 = arith.constant 0 : index
    %c0_40 = arith.constant 0 : index
    %c0_41 = arith.constant 0 : index
    %46 = vector.load %arg11[%c0_39, %c0_40, %c0_41] : memref<2x1x128xf32, #tpu.memory_space<vmem>>, vector<1x1x128xf32>
    %47 = vector.shape_cast %46 : vector<1x1x128xf32> to vector<1x128xf32>
    %c0_42 = arith.constant 0 : index
    %c0_43 = arith.constant 0 : index
    %c0_44 = arith.constant 0 : index
    %48 = vector.load %arg12[%c0_42, %c0_43, %c0_44] : memref<2x128x32xbf16, #tpu.memory_space<vmem>>, vector<1x128x32xbf16>
    %49 = vector.shape_cast %48 : vector<1x128x32xbf16> to vector<128x32xbf16>
    %c0_45 = arith.constant 0 : index
    %c0_46 = arith.constant 0 : index
    %c0_47 = arith.constant 0 : index
    %50 = vector.load %arg13[%c0_45, %c0_46, %c0_47] : memref<2x1x32xf32, #tpu.memory_space<vmem>>, vector<1x1x32xf32>
    %51 = vector.shape_cast %50 : vector<1x1x32xf32> to vector<1x32xf32>
    %c0_48 = arith.constant 0 : index
    %c0_49 = arith.constant 0 : index
    %c0_50 = arith.constant 0 : index
    %52 = vector.load %arg14[%c0_48, %c0_49, %c0_50] : memref<2x1x32xf32, #tpu.memory_space<vmem>>, vector<1x1x32xf32>
    %53 = vector.shape_cast %52 : vector<1x1x32xf32> to vector<1x32xf32>
    %c0_51 = arith.constant 0 : index
    %c0_52 = arith.constant 0 : index
    %c0_53 = arith.constant 0 : index
    %54 = vector.load %arg15[%c0_51, %c0_52, %c0_53] : memref<2x1x32xf32, #tpu.memory_space<vmem>>, vector<1x1x32xf32>
    %55 = vector.shape_cast %54 : vector<1x1x32xf32> to vector<1x32xf32>
    %56 = arith.truncf %19 : vector<8x32xf32> to vector<8x32xbf16>
    %cst = arith.constant dense<0.000000e+00> : vector<8x128xf32>
    %57 = tpu.matmul %56, %33, %cst {dimension_numbers = #tpu.dot_dimension_numbers<[1], [0], [0], [1], [0, 0, 1, 1], [], []>} : vector<8x32xbf16>, vector<32x128xbf16>, vector<8x128xf32> -> vector<8x128xf32>
    %58 = vector.broadcast %35 : vector<1x128xf32> to vector<8x128xf32>
    %59 = arith.addf %57, %58 : vector<8x128xf32>
    %60 = vector.broadcast %6 : vector<8x1xf32> to vector<8x128xf32>
    %61 = arith.mulf %59, %60 : vector<8x128xf32>
    %62 = vector.extract_strided_slice %61 {offsets = [0, 0], sizes = [8, 64], strides = [1, 1]} : vector<8x128xf32> to vector<8x64xf32>
    %63 = vector.extract_strided_slice %61 {offsets = [0, 64], sizes = [8, 64], strides = [1, 1]} : vector<8x128xf32> to vector<8x64xf32>
    %cst_54 = arith.constant 0.000000e+00 : f32
    %64 = vector.broadcast %cst_54 : f32 to vector<1x64xf32>
    %65 = vector.extract_strided_slice %62 {offsets = [0, 0], sizes = [7, 64], strides = [1, 1]} : vector<8x64xf32> to vector<7x64xf32>
    %66 = tpu.concatenate %64, %65 in 0 : vector<1x64xf32>, vector<7x64xf32> -> vector<8x64xf32>
    %cst_55 = arith.constant 0.000000e+00 : f32
    %67 = vector.broadcast %cst_55 : f32 to vector<1x64xf32>
    %68 = vector.extract_strided_slice %63 {offsets = [0, 0], sizes = [7, 64], strides = [1, 1]} : vector<8x64xf32> to vector<7x64xf32>
    %69 = tpu.concatenate %67, %68 in 0 : vector<1x64xf32>, vector<7x64xf32> -> vector<8x64xf32>
    %70 = vector.broadcast %21 : vector<1x64xf32> to vector<8x64xf32>
    %71 = arith.mulf %70, %66 : vector<8x64xf32>
    %72 = vector.broadcast %23 : vector<1x64xf32> to vector<8x64xf32>
    %73 = arith.mulf %72, %69 : vector<8x64xf32>
    %74 = arith.subf %71, %73 : vector<8x64xf32>
    %75 = vector.broadcast %10 : vector<8x1xf32> to vector<8x64xf32>
    %76 = arith.mulf %75, %74 : vector<8x64xf32>
    %77 = arith.addf %62, %76 : vector<8x64xf32>
    %78 = vector.broadcast %21 : vector<1x64xf32> to vector<8x64xf32>
    %79 = arith.mulf %78, %69 : vector<8x64xf32>
    %80 = vector.broadcast %23 : vector<1x64xf32> to vector<8x64xf32>
    %81 = arith.mulf %80, %66 : vector<8x64xf32>
    %82 = arith.addf %79, %81 : vector<8x64xf32>
    %83 = vector.broadcast %10 : vector<8x1xf32> to vector<8x64xf32>
    %84 = arith.mulf %83, %82 : vector<8x64xf32>
    %85 = arith.addf %63, %84 : vector<8x64xf32>
    %cst_56 = arith.constant 0.000000e+00 : f32
    %86 = vector.broadcast %cst_56 : f32 to vector<2x64xf32>
    %87 = vector.extract_strided_slice %77 {offsets = [0, 0], sizes = [6, 64], strides = [1, 1]} : vector<8x64xf32> to vector<6x64xf32>
    %88 = tpu.concatenate %86, %87 in 0 : vector<2x64xf32>, vector<6x64xf32> -> vector<8x64xf32>
    %cst_57 = arith.constant 0.000000e+00 : f32
    %89 = vector.broadcast %cst_57 : f32 to vector<2x64xf32>
    %90 = vector.extract_strided_slice %85 {offsets = [0, 0], sizes = [6, 64], strides = [1, 1]} : vector<8x64xf32> to vector<6x64xf32>
    %91 = tpu.concatenate %89, %90 in 0 : vector<2x64xf32>, vector<6x64xf32> -> vector<8x64xf32>
    %92 = vector.broadcast %25 : vector<1x64xf32> to vector<8x64xf32>
    %93 = arith.mulf %92, %88 : vector<8x64xf32>
    %94 = vector.broadcast %27 : vector<1x64xf32> to vector<8x64xf32>
    %95 = arith.mulf %94, %91 : vector<8x64xf32>
    %96 = arith.subf %93, %95 : vector<8x64xf32>
    %97 = vector.broadcast %14 : vector<8x1xf32> to vector<8x64xf32>
    %98 = arith.mulf %97, %96 : vector<8x64xf32>
    %99 = arith.addf %77, %98 : vector<8x64xf32>
    %100 = vector.broadcast %25 : vector<1x64xf32> to vector<8x64xf32>
    %101 = arith.mulf %100, %91 : vector<8x64xf32>
    %102 = vector.broadcast %27 : vector<1x64xf32> to vector<8x64xf32>
    %103 = arith.mulf %102, %88 : vector<8x64xf32>
    %104 = arith.addf %101, %103 : vector<8x64xf32>
    %105 = vector.broadcast %14 : vector<8x1xf32> to vector<8x64xf32>
    %106 = arith.mulf %105, %104 : vector<8x64xf32>
    %107 = arith.addf %85, %106 : vector<8x64xf32>
    %cst_58 = arith.constant 0.000000e+00 : f32
    %108 = vector.broadcast %cst_58 : f32 to vector<4x64xf32>
    %109 = vector.extract_strided_slice %99 {offsets = [0, 0], sizes = [4, 64], strides = [1, 1]} : vector<8x64xf32> to vector<4x64xf32>
    %110 = tpu.concatenate %108, %109 in 0 : vector<4x64xf32>, vector<4x64xf32> -> vector<8x64xf32>
    %cst_59 = arith.constant 0.000000e+00 : f32
    %111 = vector.broadcast %cst_59 : f32 to vector<4x64xf32>
    %112 = vector.extract_strided_slice %107 {offsets = [0, 0], sizes = [4, 64], strides = [1, 1]} : vector<8x64xf32> to vector<4x64xf32>
    %113 = tpu.concatenate %111, %112 in 0 : vector<4x64xf32>, vector<4x64xf32> -> vector<8x64xf32>
    %114 = vector.broadcast %29 : vector<1x64xf32> to vector<8x64xf32>
    %115 = arith.mulf %114, %110 : vector<8x64xf32>
    %116 = vector.broadcast %31 : vector<1x64xf32> to vector<8x64xf32>
    %117 = arith.mulf %116, %113 : vector<8x64xf32>
    %118 = arith.subf %115, %117 : vector<8x64xf32>
    %119 = vector.broadcast %18 : vector<8x1xf32> to vector<8x64xf32>
    %120 = arith.mulf %119, %118 : vector<8x64xf32>
    %121 = arith.addf %99, %120 : vector<8x64xf32>
    %122 = vector.broadcast %29 : vector<1x64xf32> to vector<8x64xf32>
    %123 = arith.mulf %122, %113 : vector<8x64xf32>
    %124 = vector.broadcast %31 : vector<1x64xf32> to vector<8x64xf32>
    %125 = arith.mulf %124, %110 : vector<8x64xf32>
    %126 = arith.addf %123, %125 : vector<8x64xf32>
    %127 = vector.broadcast %18 : vector<8x1xf32> to vector<8x64xf32>
    %128 = arith.mulf %127, %126 : vector<8x64xf32>
    %129 = arith.addf %107, %128 : vector<8x64xf32>
    %130 = tpu.concatenate %121, %129 in 1 : vector<8x64xf32>, vector<8x64xf32> -> vector<8x128xf32>
    %131 = arith.truncf %130 : vector<8x128xf32> to vector<8x128xbf16>
    %cst_60 = arith.constant dense<0.000000e+00> : vector<8x32xf32>
    %132 = tpu.matmul %131, %37, %cst_60 {dimension_numbers = #tpu.dot_dimension_numbers<[1], [0], [0], [1], [0, 0, 1, 1], [], []>} : vector<8x128xbf16>, vector<128x32xbf16>, vector<8x32xf32> -> vector<8x32xf32>
    %133 = vector.broadcast %39 : vector<1x32xf32> to vector<8x32xf32>
    %134 = arith.addf %132, %133 : vector<8x32xf32>
    %135 = arith.addf %134, %19 : vector<8x32xf32>
    %cst_61 = arith.constant dense<0.000000e+00> : vector<8xf32>
    %136 = vector.multi_reduction <add>, %135, %cst_61 [1] : vector<8x32xf32> to vector<8xf32>
    %137 = vector.shape_cast %136 : vector<8xf32> to vector<8x1xf32>
    %cst_62 = arith.constant 3.200000e+01 : f32
    %138 = vector.broadcast %cst_62 : f32 to vector<8x1xf32>
    %139 = arith.divf %137, %138 : vector<8x1xf32>
    %140 = vector.broadcast %139 : vector<8x1xf32> to vector<8x32xf32>
    %141 = arith.subf %135, %140 : vector<8x32xf32>
    %142 = arith.mulf %141, %141 : vector<8x32xf32>
    %cst_63 = arith.constant dense<0.000000e+00> : vector<8xf32>
    %143 = vector.multi_reduction <add>, %142, %cst_63 [1] : vector<8x32xf32> to vector<8xf32>
    %144 = vector.shape_cast %143 : vector<8xf32> to vector<8x1xf32>
    %cst_64 = arith.constant 3.200000e+01 : f32
    %145 = vector.broadcast %cst_64 : f32 to vector<8x1xf32>
    %146 = arith.divf %144, %145 : vector<8x1xf32>
    %147 = vector.broadcast %139 : vector<8x1xf32> to vector<8x32xf32>
    %148 = arith.subf %135, %147 : vector<8x32xf32>
    %cst_65 = arith.constant 9.99999974E-6 : f32
    %149 = vector.broadcast %cst_65 : f32 to vector<8x1xf32>
    %150 = arith.addf %146, %149 : vector<8x1xf32>
    %151 = math.rsqrt %150 : vector<8x1xf32>
    %152 = vector.broadcast %151 : vector<8x1xf32> to vector<8x32xf32>
    %153 = arith.mulf %148, %152 : vector<8x32xf32>
    %154 = vector.broadcast %41 : vector<1x32xf32> to vector<8x32xf32>
    %155 = arith.mulf %153, %154 : vector<8x32xf32>
    %156 = vector.broadcast %43 : vector<1x32xf32> to vector<8x32xf32>
    %157 = arith.addf %155, %156 : vector<8x32xf32>
    %158 = arith.truncf %157 : vector<8x32xf32> to vector<8x32xbf16>
    %cst_66 = arith.constant dense<0.000000e+00> : vector<8x128xf32>
    %159 = tpu.matmul %158, %45, %cst_66 {dimension_numbers = #tpu.dot_dimension_numbers<[1], [0], [0], [1], [0, 0, 1, 1], [], []>} : vector<8x32xbf16>, vector<32x128xbf16>, vector<8x128xf32> -> vector<8x128xf32>
    %160 = vector.broadcast %47 : vector<1x128xf32> to vector<8x128xf32>
    %161 = arith.addf %159, %160 : vector<8x128xf32>
    %cst_67 = arith.constant 5.000000e-01 : f32
    %162 = vector.broadcast %cst_67 : f32 to vector<8x128xf32>
    %163 = arith.mulf %162, %161 : vector<8x128xf32>
    %cst_68 = arith.constant 4.471500e-02 : f32
    %164 = vector.broadcast %cst_68 : f32 to vector<8x128xf32>
    %165 = arith.mulf %164, %161 : vector<8x128xf32>
    %166 = arith.mulf %165, %161 : vector<8x128xf32>
    %167 = arith.mulf %166, %161 : vector<8x128xf32>
    %168 = arith.addf %161, %167 : vector<8x128xf32>
    %cst_69 = arith.constant 0.797884583 : f32
    %169 = vector.broadcast %cst_69 : f32 to vector<8x128xf32>
    %170 = arith.mulf %169, %168 : vector<8x128xf32>
    %171 = math.tanh %170 : vector<8x128xf32>
    %cst_70 = arith.constant 1.000000e+00 : f32
    %172 = vector.broadcast %cst_70 : f32 to vector<8x128xf32>
    %173 = arith.addf %172, %171 : vector<8x128xf32>
    %174 = arith.mulf %163, %173 : vector<8x128xf32>
    %175 = arith.truncf %174 : vector<8x128xf32> to vector<8x128xbf16>
    %cst_71 = arith.constant dense<0.000000e+00> : vector<8x32xf32>
    %176 = tpu.matmul %175, %49, %cst_71 {dimension_numbers = #tpu.dot_dimension_numbers<[1], [0], [0], [1], [0, 0, 1, 1], [], []>} : vector<8x128xbf16>, vector<128x32xbf16>, vector<8x32xf32> -> vector<8x32xf32>
    %177 = vector.broadcast %51 : vector<1x32xf32> to vector<8x32xf32>
    %178 = arith.addf %176, %177 : vector<8x32xf32>
    %179 = arith.addf %178, %157 : vector<8x32xf32>
    %cst_72 = arith.constant dense<0.000000e+00> : vector<8xf32>
    %180 = vector.multi_reduction <add>, %179, %cst_72 [1] : vector<8x32xf32> to vector<8xf32>
    %181 = vector.shape_cast %180 : vector<8xf32> to vector<8x1xf32>
    %cst_73 = arith.constant 3.200000e+01 : f32
    %182 = vector.broadcast %cst_73 : f32 to vector<8x1xf32>
    %183 = arith.divf %181, %182 : vector<8x1xf32>
    %184 = vector.broadcast %183 : vector<8x1xf32> to vector<8x32xf32>
    %185 = arith.subf %179, %184 : vector<8x32xf32>
    %186 = arith.mulf %185, %185 : vector<8x32xf32>
    %cst_74 = arith.constant dense<0.000000e+00> : vector<8xf32>
    %187 = vector.multi_reduction <add>, %186, %cst_74 [1] : vector<8x32xf32> to vector<8xf32>
    %188 = vector.shape_cast %187 : vector<8xf32> to vector<8x1xf32>
    %cst_75 = arith.constant 3.200000e+01 : f32
    %189 = vector.broadcast %cst_75 : f32 to vector<8x1xf32>
    %190 = arith.divf %188, %189 : vector<8x1xf32>
    %191 = vector.broadcast %183 : vector<8x1xf32> to vector<8x32xf32>
    %192 = arith.subf %179, %191 : vector<8x32xf32>
    %cst_76 = arith.constant 9.99999974E-6 : f32
    %193 = vector.broadcast %cst_76 : f32 to vector<8x1xf32>
    %194 = arith.addf %190, %193 : vector<8x1xf32>
    %195 = math.rsqrt %194 : vector<8x1xf32>
    %196 = vector.broadcast %195 : vector<8x1xf32> to vector<8x32xf32>
    %197 = arith.mulf %192, %196 : vector<8x32xf32>
    %198 = vector.broadcast %53 : vector<1x32xf32> to vector<8x32xf32>
    %199 = arith.mulf %197, %198 : vector<8x32xf32>
    %200 = vector.broadcast %55 : vector<1x32xf32> to vector<8x32xf32>
    %201 = arith.addf %199, %200 : vector<8x32xf32>
    %c1_77 = arith.constant 1 : index
    %c0_78 = arith.constant 0 : index
    %c0_79 = arith.constant 0 : index
    %202 = vector.load %arg4[%c1_77, %c0_78, %c0_79] : memref<2x3x64xf32, #tpu.memory_space<vmem>>, vector<1x1x64xf32>
    %203 = vector.shape_cast %202 : vector<1x1x64xf32> to vector<1x64xf32>
    %c1_80 = arith.constant 1 : index
    %c0_81 = arith.constant 0 : index
    %c0_82 = arith.constant 0 : index
    %204 = vector.load %arg5[%c1_80, %c0_81, %c0_82] : memref<2x3x64xf32, #tpu.memory_space<vmem>>, vector<1x1x64xf32>
    %205 = vector.shape_cast %204 : vector<1x1x64xf32> to vector<1x64xf32>
    %c1_83 = arith.constant 1 : index
    %c1_84 = arith.constant 1 : index
    %c0_85 = arith.constant 0 : index
    %206 = vector.load %arg4[%c1_83, %c1_84, %c0_85] : memref<2x3x64xf32, #tpu.memory_space<vmem>>, vector<1x1x64xf32>
    %207 = vector.shape_cast %206 : vector<1x1x64xf32> to vector<1x64xf32>
    %c1_86 = arith.constant 1 : index
    %c1_87 = arith.constant 1 : index
    %c0_88 = arith.constant 0 : index
    %208 = vector.load %arg5[%c1_86, %c1_87, %c0_88] : memref<2x3x64xf32, #tpu.memory_space<vmem>>, vector<1x1x64xf32>
    %209 = vector.shape_cast %208 : vector<1x1x64xf32> to vector<1x64xf32>
    %c1_89 = arith.constant 1 : index
    %c2_90 = arith.constant 2 : index
    %c0_91 = arith.constant 0 : index
    %210 = vector.load %arg4[%c1_89, %c2_90, %c0_91] : memref<2x3x64xf32, #tpu.memory_space<vmem>>, vector<1x1x64xf32>
    %211 = vector.shape_cast %210 : vector<1x1x64xf32> to vector<1x64xf32>
    %c1_92 = arith.constant 1 : index
    %c2_93 = arith.constant 2 : index
    %c0_94 = arith.constant 0 : index
    %212 = vector.load %arg5[%c1_92, %c2_93, %c0_94] : memref<2x3x64xf32, #tpu.memory_space<vmem>>, vector<1x1x64xf32>
    %213 = vector.shape_cast %212 : vector<1x1x64xf32> to vector<1x64xf32>
    %c1_95 = arith.constant 1 : index
    %c0_96 = arith.constant 0 : index
    %c0_97 = arith.constant 0 : index
    %214 = vector.load %arg2[%c1_95, %c0_96, %c0_97] : memref<2x32x128xbf16, #tpu.memory_space<vmem>>, vector<1x32x128xbf16>
    %215 = vector.shape_cast %214 : vector<1x32x128xbf16> to vector<32x128xbf16>
    %c1_98 = arith.constant 1 : index
    %c0_99 = arith.constant 0 : index
    %c0_100 = arith.constant 0 : index
    %216 = vector.load %arg3[%c1_98, %c0_99, %c0_100] : memref<2x1x128xf32, #tpu.memory_space<vmem>>, vector<1x1x128xf32>
    %217 = vector.shape_cast %216 : vector<1x1x128xf32> to vector<1x128xf32>
    %c1_101 = arith.constant 1 : index
    %c0_102 = arith.constant 0 : index
    %c0_103 = arith.constant 0 : index
    %218 = vector.load %arg6[%c1_101, %c0_102, %c0_103] : memref<2x128x32xbf16, #tpu.memory_space<vmem>>, vector<1x128x32xbf16>
    %219 = vector.shape_cast %218 : vector<1x128x32xbf16> to vector<128x32xbf16>
    %c1_104 = arith.constant 1 : index
    %c0_105 = arith.constant 0 : index
    %c0_106 = arith.constant 0 : index
    %220 = vector.load %arg7[%c1_104, %c0_105, %c0_106] : memref<2x1x32xf32, #tpu.memory_space<vmem>>, vector<1x1x32xf32>
    %221 = vector.shape_cast %220 : vector<1x1x32xf32> to vector<1x32xf32>
    %c1_107 = arith.constant 1 : index
    %c0_108 = arith.constant 0 : index
    %c0_109 = arith.constant 0 : index
    %222 = vector.load %arg8[%c1_107, %c0_108, %c0_109] : memref<2x1x32xf32, #tpu.memory_space<vmem>>, vector<1x1x32xf32>
    %223 = vector.shape_cast %222 : vector<1x1x32xf32> to vector<1x32xf32>
    %c1_110 = arith.constant 1 : index
    %c0_111 = arith.constant 0 : index
    %c0_112 = arith.constant 0 : index
    %224 = vector.load %arg9[%c1_110, %c0_111, %c0_112] : memref<2x1x32xf32, #tpu.memory_space<vmem>>, vector<1x1x32xf32>
    %225 = vector.shape_cast %224 : vector<1x1x32xf32> to vector<1x32xf32>
    %c1_113 = arith.constant 1 : index
    %c0_114 = arith.constant 0 : index
    %c0_115 = arith.constant 0 : index
    %226 = vector.load %arg10[%c1_113, %c0_114, %c0_115] : memref<2x32x128xbf16, #tpu.memory_space<vmem>>, vector<1x32x128xbf16>
    %227 = vector.shape_cast %226 : vector<1x32x128xbf16> to vector<32x128xbf16>
    %c1_116 = arith.constant 1 : index
    %c0_117 = arith.constant 0 : index
    %c0_118 = arith.constant 0 : index
    %228 = vector.load %arg11[%c1_116, %c0_117, %c0_118] : memref<2x1x128xf32, #tpu.memory_space<vmem>>, vector<1x1x128xf32>
    %229 = vector.shape_cast %228 : vector<1x1x128xf32> to vector<1x128xf32>
    %c1_119 = arith.constant 1 : index
    %c0_120 = arith.constant 0 : index
    %c0_121 = arith.constant 0 : index
    %230 = vector.load %arg12[%c1_119, %c0_120, %c0_121] : memref<2x128x32xbf16, #tpu.memory_space<vmem>>, vector<1x128x32xbf16>
    %231 = vector.shape_cast %230 : vector<1x128x32xbf16> to vector<128x32xbf16>
    %c1_122 = arith.constant 1 : index
    %c0_123 = arith.constant 0 : index
    %c0_124 = arith.constant 0 : index
    %232 = vector.load %arg13[%c1_122, %c0_123, %c0_124] : memref<2x1x32xf32, #tpu.memory_space<vmem>>, vector<1x1x32xf32>
    %233 = vector.shape_cast %232 : vector<1x1x32xf32> to vector<1x32xf32>
    %c1_125 = arith.constant 1 : index
    %c0_126 = arith.constant 0 : index
    %c0_127 = arith.constant 0 : index
    %234 = vector.load %arg14[%c1_125, %c0_126, %c0_127] : memref<2x1x32xf32, #tpu.memory_space<vmem>>, vector<1x1x32xf32>
    %235 = vector.shape_cast %234 : vector<1x1x32xf32> to vector<1x32xf32>
    %c1_128 = arith.constant 1 : index
    %c0_129 = arith.constant 0 : index
    %c0_130 = arith.constant 0 : index
    %236 = vector.load %arg15[%c1_128, %c0_129, %c0_130] : memref<2x1x32xf32, #tpu.memory_space<vmem>>, vector<1x1x32xf32>
    %237 = vector.shape_cast %236 : vector<1x1x32xf32> to vector<1x32xf32>
    %238 = arith.truncf %201 : vector<8x32xf32> to vector<8x32xbf16>
    %cst_131 = arith.constant dense<0.000000e+00> : vector<8x128xf32>
    %239 = tpu.matmul %238, %215, %cst_131 {dimension_numbers = #tpu.dot_dimension_numbers<[1], [0], [0], [1], [0, 0, 1, 1], [], []>} : vector<8x32xbf16>, vector<32x128xbf16>, vector<8x128xf32> -> vector<8x128xf32>
    %240 = vector.broadcast %217 : vector<1x128xf32> to vector<8x128xf32>
    %241 = arith.addf %239, %240 : vector<8x128xf32>
    %242 = vector.broadcast %6 : vector<8x1xf32> to vector<8x128xf32>
    %243 = arith.mulf %241, %242 : vector<8x128xf32>
    %244 = vector.extract_strided_slice %243 {offsets = [0, 0], sizes = [8, 64], strides = [1, 1]} : vector<8x128xf32> to vector<8x64xf32>
    %245 = vector.extract_strided_slice %243 {offsets = [0, 64], sizes = [8, 64], strides = [1, 1]} : vector<8x128xf32> to vector<8x64xf32>
    %cst_132 = arith.constant 0.000000e+00 : f32
    %246 = vector.broadcast %cst_132 : f32 to vector<1x64xf32>
    %247 = vector.extract_strided_slice %244 {offsets = [0, 0], sizes = [7, 64], strides = [1, 1]} : vector<8x64xf32> to vector<7x64xf32>
    %248 = tpu.concatenate %246, %247 in 0 : vector<1x64xf32>, vector<7x64xf32> -> vector<8x64xf32>
    %cst_133 = arith.constant 0.000000e+00 : f32
    %249 = vector.broadcast %cst_133 : f32 to vector<1x64xf32>
    %250 = vector.extract_strided_slice %245 {offsets = [0, 0], sizes = [7, 64], strides = [1, 1]} : vector<8x64xf32> to vector<7x64xf32>
    %251 = tpu.concatenate %249, %250 in 0 : vector<1x64xf32>, vector<7x64xf32> -> vector<8x64xf32>
    %252 = vector.broadcast %203 : vector<1x64xf32> to vector<8x64xf32>
    %253 = arith.mulf %252, %248 : vector<8x64xf32>
    %254 = vector.broadcast %205 : vector<1x64xf32> to vector<8x64xf32>
    %255 = arith.mulf %254, %251 : vector<8x64xf32>
    %256 = arith.subf %253, %255 : vector<8x64xf32>
    %257 = vector.broadcast %10 : vector<8x1xf32> to vector<8x64xf32>
    %258 = arith.mulf %257, %256 : vector<8x64xf32>
    %259 = arith.addf %244, %258 : vector<8x64xf32>
    %260 = vector.broadcast %203 : vector<1x64xf32> to vector<8x64xf32>
    %261 = arith.mulf %260, %251 : vector<8x64xf32>
    %262 = vector.broadcast %205 : vector<1x64xf32> to vector<8x64xf32>
    %263 = arith.mulf %262, %248 : vector<8x64xf32>
    %264 = arith.addf %261, %263 : vector<8x64xf32>
    %265 = vector.broadcast %10 : vector<8x1xf32> to vector<8x64xf32>
    %266 = arith.mulf %265, %264 : vector<8x64xf32>
    %267 = arith.addf %245, %266 : vector<8x64xf32>
    %cst_134 = arith.constant 0.000000e+00 : f32
    %268 = vector.broadcast %cst_134 : f32 to vector<2x64xf32>
    %269 = vector.extract_strided_slice %259 {offsets = [0, 0], sizes = [6, 64], strides = [1, 1]} : vector<8x64xf32> to vector<6x64xf32>
    %270 = tpu.concatenate %268, %269 in 0 : vector<2x64xf32>, vector<6x64xf32> -> vector<8x64xf32>
    %cst_135 = arith.constant 0.000000e+00 : f32
    %271 = vector.broadcast %cst_135 : f32 to vector<2x64xf32>
    %272 = vector.extract_strided_slice %267 {offsets = [0, 0], sizes = [6, 64], strides = [1, 1]} : vector<8x64xf32> to vector<6x64xf32>
    %273 = tpu.concatenate %271, %272 in 0 : vector<2x64xf32>, vector<6x64xf32> -> vector<8x64xf32>
    %274 = vector.broadcast %207 : vector<1x64xf32> to vector<8x64xf32>
    %275 = arith.mulf %274, %270 : vector<8x64xf32>
    %276 = vector.broadcast %209 : vector<1x64xf32> to vector<8x64xf32>
    %277 = arith.mulf %276, %273 : vector<8x64xf32>
    %278 = arith.subf %275, %277 : vector<8x64xf32>
    %279 = vector.broadcast %14 : vector<8x1xf32> to vector<8x64xf32>
    %280 = arith.mulf %279, %278 : vector<8x64xf32>
    %281 = arith.addf %259, %280 : vector<8x64xf32>
    %282 = vector.broadcast %207 : vector<1x64xf32> to vector<8x64xf32>
    %283 = arith.mulf %282, %273 : vector<8x64xf32>
    %284 = vector.broadcast %209 : vector<1x64xf32> to vector<8x64xf32>
    %285 = arith.mulf %284, %270 : vector<8x64xf32>
    %286 = arith.addf %283, %285 : vector<8x64xf32>
    %287 = vector.broadcast %14 : vector<8x1xf32> to vector<8x64xf32>
    %288 = arith.mulf %287, %286 : vector<8x64xf32>
    %289 = arith.addf %267, %288 : vector<8x64xf32>
    %cst_136 = arith.constant 0.000000e+00 : f32
    %290 = vector.broadcast %cst_136 : f32 to vector<4x64xf32>
    %291 = vector.extract_strided_slice %281 {offsets = [0, 0], sizes = [4, 64], strides = [1, 1]} : vector<8x64xf32> to vector<4x64xf32>
    %292 = tpu.concatenate %290, %291 in 0 : vector<4x64xf32>, vector<4x64xf32> -> vector<8x64xf32>
    %cst_137 = arith.constant 0.000000e+00 : f32
    %293 = vector.broadcast %cst_137 : f32 to vector<4x64xf32>
    %294 = vector.extract_strided_slice %289 {offsets = [0, 0], sizes = [4, 64], strides = [1, 1]} : vector<8x64xf32> to vector<4x64xf32>
    %295 = tpu.concatenate %293, %294 in 0 : vector<4x64xf32>, vector<4x64xf32> -> vector<8x64xf32>
    %296 = vector.broadcast %211 : vector<1x64xf32> to vector<8x64xf32>
    %297 = arith.mulf %296, %292 : vector<8x64xf32>
    %298 = vector.broadcast %213 : vector<1x64xf32> to vector<8x64xf32>
    %299 = arith.mulf %298, %295 : vector<8x64xf32>
    %300 = arith.subf %297, %299 : vector<8x64xf32>
    %301 = vector.broadcast %18 : vector<8x1xf32> to vector<8x64xf32>
    %302 = arith.mulf %301, %300 : vector<8x64xf32>
    %303 = arith.addf %281, %302 : vector<8x64xf32>
    %304 = vector.broadcast %211 : vector<1x64xf32> to vector<8x64xf32>
    %305 = arith.mulf %304, %295 : vector<8x64xf32>
    %306 = vector.broadcast %213 : vector<1x64xf32> to vector<8x64xf32>
    %307 = arith.mulf %306, %292 : vector<8x64xf32>
    %308 = arith.addf %305, %307 : vector<8x64xf32>
    %309 = vector.broadcast %18 : vector<8x1xf32> to vector<8x64xf32>
    %310 = arith.mulf %309, %308 : vector<8x64xf32>
    %311 = arith.addf %289, %310 : vector<8x64xf32>
    %312 = tpu.concatenate %303, %311 in 1 : vector<8x64xf32>, vector<8x64xf32> -> vector<8x128xf32>
    %313 = arith.truncf %312 : vector<8x128xf32> to vector<8x128xbf16>
    %cst_138 = arith.constant dense<0.000000e+00> : vector<8x32xf32>
    %314 = tpu.matmul %313, %219, %cst_138 {dimension_numbers = #tpu.dot_dimension_numbers<[1], [0], [0], [1], [0, 0, 1, 1], [], []>} : vector<8x128xbf16>, vector<128x32xbf16>, vector<8x32xf32> -> vector<8x32xf32>
    %315 = vector.broadcast %221 : vector<1x32xf32> to vector<8x32xf32>
    %316 = arith.addf %314, %315 : vector<8x32xf32>
    %317 = arith.addf %316, %201 : vector<8x32xf32>
    %cst_139 = arith.constant dense<0.000000e+00> : vector<8xf32>
    %318 = vector.multi_reduction <add>, %317, %cst_139 [1] : vector<8x32xf32> to vector<8xf32>
    %319 = vector.shape_cast %318 : vector<8xf32> to vector<8x1xf32>
    %cst_140 = arith.constant 3.200000e+01 : f32
    %320 = vector.broadcast %cst_140 : f32 to vector<8x1xf32>
    %321 = arith.divf %319, %320 : vector<8x1xf32>
    %322 = vector.broadcast %321 : vector<8x1xf32> to vector<8x32xf32>
    %323 = arith.subf %317, %322 : vector<8x32xf32>
    %324 = arith.mulf %323, %323 : vector<8x32xf32>
    %cst_141 = arith.constant dense<0.000000e+00> : vector<8xf32>
    %325 = vector.multi_reduction <add>, %324, %cst_141 [1] : vector<8x32xf32> to vector<8xf32>
    %326 = vector.shape_cast %325 : vector<8xf32> to vector<8x1xf32>
    %cst_142 = arith.constant 3.200000e+01 : f32
    %327 = vector.broadcast %cst_142 : f32 to vector<8x1xf32>
    %328 = arith.divf %326, %327 : vector<8x1xf32>
    %329 = vector.broadcast %321 : vector<8x1xf32> to vector<8x32xf32>
    %330 = arith.subf %317, %329 : vector<8x32xf32>
    %cst_143 = arith.constant 9.99999974E-6 : f32
    %331 = vector.broadcast %cst_143 : f32 to vector<8x1xf32>
    %332 = arith.addf %328, %331 : vector<8x1xf32>
    %333 = math.rsqrt %332 : vector<8x1xf32>
    %334 = vector.broadcast %333 : vector<8x1xf32> to vector<8x32xf32>
    %335 = arith.mulf %330, %334 : vector<8x32xf32>
    %336 = vector.broadcast %223 : vector<1x32xf32> to vector<8x32xf32>
    %337 = arith.mulf %335, %336 : vector<8x32xf32>
    %338 = vector.broadcast %225 : vector<1x32xf32> to vector<8x32xf32>
    %339 = arith.addf %337, %338 : vector<8x32xf32>
    %340 = arith.truncf %339 : vector<8x32xf32> to vector<8x32xbf16>
    %cst_144 = arith.constant dense<0.000000e+00> : vector<8x128xf32>
    %341 = tpu.matmul %340, %227, %cst_144 {dimension_numbers = #tpu.dot_dimension_numbers<[1], [0], [0], [1], [0, 0, 1, 1], [], []>} : vector<8x32xbf16>, vector<32x128xbf16>, vector<8x128xf32> -> vector<8x128xf32>
    %342 = vector.broadcast %229 : vector<1x128xf32> to vector<8x128xf32>
    %343 = arith.addf %341, %342 : vector<8x128xf32>
    %cst_145 = arith.constant 5.000000e-01 : f32
    %344 = vector.broadcast %cst_145 : f32 to vector<8x128xf32>
    %345 = arith.mulf %344, %343 : vector<8x128xf32>
    %cst_146 = arith.constant 4.471500e-02 : f32
    %346 = vector.broadcast %cst_146 : f32 to vector<8x128xf32>
    %347 = arith.mulf %346, %343 : vector<8x128xf32>
    %348 = arith.mulf %347, %343 : vector<8x128xf32>
    %349 = arith.mulf %348, %343 : vector<8x128xf32>
    %350 = arith.addf %343, %349 : vector<8x128xf32>
    %cst_147 = arith.constant 0.797884583 : f32
    %351 = vector.broadcast %cst_147 : f32 to vector<8x128xf32>
    %352 = arith.mulf %351, %350 : vector<8x128xf32>
    %353 = math.tanh %352 : vector<8x128xf32>
    %cst_148 = arith.constant 1.000000e+00 : f32
    %354 = vector.broadcast %cst_148 : f32 to vector<8x128xf32>
    %355 = arith.addf %354, %353 : vector<8x128xf32>
    %356 = arith.mulf %345, %355 : vector<8x128xf32>
    %357 = arith.truncf %356 : vector<8x128xf32> to vector<8x128xbf16>
    %cst_149 = arith.constant dense<0.000000e+00> : vector<8x32xf32>
    %358 = tpu.matmul %357, %231, %cst_149 {dimension_numbers = #tpu.dot_dimension_numbers<[1], [0], [0], [1], [0, 0, 1, 1], [], []>} : vector<8x128xbf16>, vector<128x32xbf16>, vector<8x32xf32> -> vector<8x32xf32>
    %359 = vector.broadcast %233 : vector<1x32xf32> to vector<8x32xf32>
    %360 = arith.addf %358, %359 : vector<8x32xf32>
    %361 = arith.addf %360, %339 : vector<8x32xf32>
    %cst_150 = arith.constant dense<0.000000e+00> : vector<8xf32>
    %362 = vector.multi_reduction <add>, %361, %cst_150 [1] : vector<8x32xf32> to vector<8xf32>
    %363 = vector.shape_cast %362 : vector<8xf32> to vector<8x1xf32>
    %cst_151 = arith.constant 3.200000e+01 : f32
    %364 = vector.broadcast %cst_151 : f32 to vector<8x1xf32>
    %365 = arith.divf %363, %364 : vector<8x1xf32>
    %366 = vector.broadcast %365 : vector<8x1xf32> to vector<8x32xf32>
    %367 = arith.subf %361, %366 : vector<8x32xf32>
    %368 = arith.mulf %367, %367 : vector<8x32xf32>
    %cst_152 = arith.constant dense<0.000000e+00> : vector<8xf32>
    %369 = vector.multi_reduction <add>, %368, %cst_152 [1] : vector<8x32xf32> to vector<8xf32>
    %370 = vector.shape_cast %369 : vector<8xf32> to vector<8x1xf32>
    %cst_153 = arith.constant 3.200000e+01 : f32
    %371 = vector.broadcast %cst_153 : f32 to vector<8x1xf32>
    %372 = arith.divf %370, %371 : vector<8x1xf32>
    %373 = vector.broadcast %365 : vector<8x1xf32> to vector<8x32xf32>
    %374 = arith.subf %361, %373 : vector<8x32xf32>
    %cst_154 = arith.constant 9.99999974E-6 : f32
    %375 = vector.broadcast %cst_154 : f32 to vector<8x1xf32>
    %376 = arith.addf %372, %375 : vector<8x1xf32>
    %377 = math.rsqrt %376 : vector<8x1xf32>
    %378 = vector.broadcast %377 : vector<8x1xf32> to vector<8x32xf32>
    %379 = arith.mulf %374, %378 : vector<8x32xf32>
    %380 = vector.broadcast %235 : vector<1x32xf32> to vector<8x32xf32>
    %381 = arith.mulf %379, %380 : vector<8x32xf32>
    %382 = vector.broadcast %237 : vector<1x32xf32> to vector<8x32xf32>
    %383 = arith.addf %381, %382 : vector<8x32xf32>
    %c0_155 = arith.constant 0 : index
    %c0_156 = arith.constant 0 : index
    %384 = vector.load %arg16[%c0_155, %c0_156] : memref<8x32xf32, #tpu.memory_space<vmem>>, vector<8x32xf32>
    tpu.vector_store %arg16[%c0_155, %c0_156], %383 {strides = array<i32>} : memref<8x32xf32, #tpu.memory_space<vmem>>, vector<8x32xf32>,
    return
  }
  func.func @transform_0(%arg0: i32) -> (i32, i32) {
    %c0_i32 = arith.constant 0 : i32
    %c0_i32_0 = arith.constant 0 : i32
    return %arg0, %c0_i32 : i32, i32
  }
  func.func @transform_1(%arg0: i32) -> (i32, i32, i32) {
    %c0_i32 = arith.constant 0 : i32
    %c0_i32_0 = arith.constant 0 : i32
    %c0_i32_1 = arith.constant 0 : i32
    %c0_i32_2 = arith.constant 0 : i32
    return %c0_i32, %c0_i32_0, %c0_i32_1 : i32, i32, i32
  }
  func.func @transform_2(%arg0: i32) -> (i32, i32, i32) {
    %c0_i32 = arith.constant 0 : i32
    %c0_i32_0 = arith.constant 0 : i32
    %c0_i32_1 = arith.constant 0 : i32
    %c0_i32_2 = arith.constant 0 : i32
    return %c0_i32, %c0_i32_0, %c0_i32_1 : i32, i32, i32
  }
  func.func @transform_3(%arg0: i32) -> (i32, i32, i32) {
    %c0_i32 = arith.constant 0 : i32
    %c0_i32_0 = arith.constant 0 : i32
    %c0_i32_1 = arith.constant 0 : i32
    %c0_i32_2 = arith.constant 0 : i32
    return %c0_i32, %c0_i32_0, %c0_i32_1 : i32, i32, i32
  }
  func.func @transform_4(%arg0: i32) -> (i32, i32, i32) {
    %c0_i32 = arith.constant 0 : i32
    %c0_i32_0 = arith.constant 0 : i32
    %c0_i32_1 = arith.constant 0 : i32
    %c0_i32_2 = arith.constant 0 : i32
    return %c0_i32, %c0_i32_0, %c0_i32_1 : i32, i32, i32
  }
  func.func @transform_5(%arg0: i32) -> (i32, i32, i32) {
    %c0_i32 = arith.constant 0 : i32
    %c0_i32_0 = arith.constant 0 : i32
    %c0_i32_1 = arith.constant 0 : i32
    %c0_i32_2 = arith.constant 0 : i32
    return %c0_i32, %c0_i32_0, %c0_i32_1 : i32, i32, i32
  }
  func.func @transform_6(%arg0: i32) -> (i32, i32, i32) {
    %c0_i32 = arith.constant 0 : i32
    %c0_i32_0 = arith.constant 0 : i32
    %c0_i32_1 = arith.constant 0 : i32
    %c0_i32_2 = arith.constant 0 : i32
    return %c0_i32, %c0_i32_0, %c0_i32_1 : i32, i32, i32
  }
  func.func @transform_7(%arg0: i32) -> (i32, i32, i32) {
    %c0_i32 = arith.constant 0 : i32
    %c0_i32_0 = arith.constant 0 : i32
    %c0_i32_1 = arith.constant 0 : i32
    %c0_i32_2 = arith.constant 0 : i32
    return %c0_i32, %c0_i32_0, %c0_i32_1 : i32, i32, i32
  }
  func.func @transform_8(%arg0: i32) -> (i32, i32, i32) {
    %c0_i32 = arith.constant 0 : i32
    %c0_i32_0 = arith.constant 0 : i32
    %c0_i32_1 = arith.constant 0 : i32
    %c0_i32_2 = arith.constant 0 : i32
    return %c0_i32, %c0_i32_0, %c0_i32_1 : i32, i32, i32
  }
  func.func @transform_9(%arg0: i32) -> (i32, i32, i32) {
    %c0_i32 = arith.constant 0 : i32
    %c0_i32_0 = arith.constant 0 : i32
    %c0_i32_1 = arith.constant 0 : i32
    %c0_i32_2 = arith.constant 0 : i32
    return %c0_i32, %c0_i32_0, %c0_i32_1 : i32, i32, i32
  }
  func.func @transform_10(%arg0: i32) -> (i32, i32, i32) {
    %c0_i32 = arith.constant 0 : i32
    %c0_i32_0 = arith.constant 0 : i32
    %c0_i32_1 = arith.constant 0 : i32
    %c0_i32_2 = arith.constant 0 : i32
    return %c0_i32, %c0_i32_0, %c0_i32_1 : i32, i32, i32
  }
  func.func @transform_11(%arg0: i32) -> (i32, i32, i32) {
    %c0_i32 = arith.constant 0 : i32
    %c0_i32_0 = arith.constant 0 : i32
    %c0_i32_1 = arith.constant 0 : i32
    %c0_i32_2 = arith.constant 0 : i32
    return %c0_i32, %c0_i32_0, %c0_i32_1 : i32, i32, i32
  }
  func.func @transform_12(%arg0: i32) -> (i32, i32, i32) {
    %c0_i32 = arith.constant 0 : i32
    %c0_i32_0 = arith.constant 0 : i32
    %c0_i32_1 = arith.constant 0 : i32
    %c0_i32_2 = arith.constant 0 : i32
    return %c0_i32, %c0_i32_0, %c0_i32_1 : i32, i32, i32
  }
  func.func @transform_13(%arg0: i32) -> (i32, i32, i32) {
    %c0_i32 = arith.constant 0 : i32
    %c0_i32_0 = arith.constant 0 : i32
    %c0_i32_1 = arith.constant 0 : i32
    %c0_i32_2 = arith.constant 0 : i32
    return %c0_i32, %c0_i32_0, %c0_i32_1 : i32, i32, i32
  }
  func.func @transform_14(%arg0: i32) -> (i32, i32, i32) {
    %c0_i32 = arith.constant 0 : i32
    %c0_i32_0 = arith.constant 0 : i32
    %c0_i32_1 = arith.constant 0 : i32
    %c0_i32_2 = arith.constant 0 : i32
    return %c0_i32, %c0_i32_0, %c0_i32_1 : i32, i32, i32
  }
  func.func @transform_15(%arg0: i32) -> (i32, i32) {
    %c0_i32 = arith.constant 0 : i32
    %c0_i32_0 = arith.constant 0 : i32
    return %arg0, %c0_i32 : i32, i32
  }
}

</mosaic_0001>

<bundles_post_ra>
// kernel: tpu_custom_call.1
= control target key start
LH: loop header
LB: loop body
LE: loop exit
PB: predicated region body
PF: predicated region fallthrough
CT: control target
= control target key end

     0   :  { %6 = vsyncpa [#allocation3], 0  ;;  %s125_s0 = inlined_call_operand.hbm [shape: f32[8,128], index: 0, kind: input, shape index: {}]   ;;  %s126_s1 = inlined_call_operand.hbm [shape: f32[8,128], index: 1, kind: output, shape index: {}]  }
   0x1   :  { %7 = vsyncpa [#allocation4], 0  ;;  %s89_s6 = smov [#allocation2]   ;;  %s41_s10 = scalar_lea.hbm %s125_s0, 128 }
   0x2   :  { %s14_s7 = sshll.u32 %s89_s6, 4  ;;  %p42_p0 = scmp.ne.s32.totalorder %s125_s0, %s41_s10  ;;  %s15_s7 = int_to_ptr.vmem [resolvable:$true] %s14_s7 }
   0x3   :  { %p45_p1 = scmp.lt.u32.totalorder %s41_s10, %s125_s0 }
   0x5   :  { %p47_p2 = pnand %p45_p1, %p42_p0 }
   0x7   :  { %50 = shalt.err (!%p47_p2)
}
   0x8   :  { %s51_s15 = scalar_lea.vmem %s15_s7, 128  ;;  %p56_p4 = scmp.lt.s32.totalorder %s15_s7, %s15_s7 }
   0x9   :  { %p52_p3 = scmp.ne.s32.totalorder %s15_s7, %s51_s15  ;;  %p57_p5 = scmp.lt.s32.totalorder %s51_s15, %s51_s15 }
   0xb   :  { %p58_p6 = por %p57_p5, %p56_p4 }
   0xd   :  { %p59_p7 = pnand %p58_p6, %p52_p3 }
   0xf   :  { %62 = shalt.err (!%p59_p7)
}
  0x10   :  { %17 = dma.hbm_to_vmem [thread:$0]  %s125_s0, 128, %s15_s7, [#allocation3]  }
  0x11   :  { %85 = dma.done.wait [#allocation3], 128  }
  0x12   :  { %86 = vsyncadd [#allocation3], 4294967168  ;;  %s90_s18 = smov [#allocation5]   ;;  %v21_v0 = vld [vmem:[#allocation2] sm:$0xff] }
  0x13   :  { %s30_s19 = sshll.u32 %s90_s18, 4  ;;  %v22_v1 = vrot.slane %v21_v0, 7  ;;  %s31_s19 = int_to_ptr.vmem [resolvable:$true] %s30_s19 }
  0x14   :  { %s63_s20 = scalar_lea.vmem %s31_s19, 128  ;;  %p68_p9 = scmp.lt.s32.totalorder %s31_s19, %s31_s19 }
  0x15   :  { %23 = vst [vmem:[#allocation5] sm:$0xff] %v22_v1  ;;  %p64_p8 = scmp.ne.s32.totalorder %s31_s19, %s63_s20  ;;  %p69_p10 = scmp.lt.s32.totalorder %s63_s20, %s63_s20 }
  0x17   :  { %p70_p11 = por %p69_p10, %p68_p9 }
  0x19   :  { %p71_p12 = pnand %p70_p11, %p64_p8 }
  0x1b   :  { %74 = shalt.err (!%p71_p12)
}
  0x1c   :  { %s75_s23 = scalar_lea.hbm %s126_s1, 128 }
  0x1d   :  { %p76_p13 = scmp.ne.s32.totalorder %s126_s1, %s75_s23  ;;  %p79_p0 = scmp.lt.u32.totalorder %s75_s23, %s126_s1 }
  0x1f   :  { %p81_p1 = pnand %p79_p0, %p76_p13 }
  0x21   :  { %84 = shalt.err (!%p81_p1)
}
  0x22   :  { %33 = dma.vmem_to_hbm [thread:$0]  %s31_s19, 128, %s126_s1, [#allocation4]  }
  0x23   :  { %87 = dma.done.wait [#allocation4], 128  }
  0x24   :  { %88 = vsyncadd [#allocation4], 4294967168 }
  0x25   :  { %37 = vsyncpa [#allocation3], 1 }
  0x26   :  { %38 = vsyncpa [#allocation4], 1 }

// kernel: tpu_custom_call.1
= control target key start
LH: loop header
LB: loop body
LE: loop exit
PB: predicated region body
PF: predicated region fallthrough
CT: control target
= control target key end

     0   :  { %s3824_s0 = inlined_call_operand.hbm [shape: f32[16,32], index: 0, kind: input, shape index: {}]   ;;  %s3825_s1 = inlined_call_operand.hbm [shape: bf16[2,32,128], index: 1, kind: input, shape index: {}]   ;;  %s3826_s2 = inlined_call_operand.hbm [shape: f32[2,1,128], index: 2, kind: input, shape index: {}]   ;;  %s3827_s3 = inlined_call_operand.hbm [shape: f32[2,3,64], index: 3, kind: input, shape index: {}]   ;;  %s3828_s4 = inlined_call_operand.hbm [shape: f32[2,3,64], index: 4, kind: input, shape index: {}]   ;;  %s3829_s5 = inlined_call_operand.hbm [shape: bf16[2,128,32], index: 5, kind: input, shape index: {}]   ;;  %s3830_s6 = inlined_call_operand.hbm [shape: f32[2,1,32], index: 6, kind: input, shape index: {}]   ;;  %s3831_s7 = inlined_call_operand.hbm [shape: f32[2,1,32], index: 7, kind: input, shape index: {}]   ;;  %s3832_s8 = inlined_call_operand.hbm [shape: f32[2,1,32], index: 8, kind: input, shape index: {}]   ;;  %s3833_s9 = inlined_call_operand.hbm [shape: bf16[2,32,128], index: 9, kind: input, shape index: {}]   ;;  %s3834_s10 = inlined_call_operand.hbm [shape: f32[2,1,128], index: 10, kind: input, shape index: {}]   ;;  %s3835_s11 = inlined_call_operand.hbm [shape: bf16[2,128,32], index: 11, kind: input, shape index: {}]   ;;  %s3836_s12 = inlined_call_operand.hbm [shape: f32[2,1,32], index: 12, kind: input, shape index: {}]   ;;  %s3837_s13 = inlined_call_operand.hbm [shape: f32[2,1,32], index: 13, kind: input, shape index: {}]   ;;  %s3838_s14 = inlined_call_operand.hbm [shape: f32[2,1,32], index: 14, kind: input, shape index: {}]   ;;  %s3839_s15 = inlined_call_operand.hbm [shape: f32[16,32], index: 15, kind: output, shape index: {}]  }
   0x1   :  { %3857 = sst [smem:[#allocation41_spill]] %s3824_s0 }
   0x2   :  { %3858 = sst [smem:[#allocation42_spill]] %s3825_s1 }
   0x3   :  { %3859 = sst [smem:[#allocation43_spill]] %s3826_s2 }
   0x4   :  { %3860 = sst [smem:[#allocation44_spill]] %s3827_s3 }
   0x5   :  { %3861 = sst [smem:[#allocation45_spill]] %s3839_s15 }
   0x6   :  { %20 = vsyncpa [#allocation3], 0 }
   0x7   :  { %22 = vsyncpa [#allocation3 + $0x1], 0 }
   0x8   :  { %23 = vsyncpa [#allocation6], 0 }
   0x9   :  { %24 = vsyncpa [#allocation9], 0 }
   0xa   :  { %25 = vsyncpa [#allocation12], 0 }
   0xb   :  { %26 = vsyncpa [#allocation15], 0 }
   0xc   :  { %27 = vsyncpa [#allocation18], 0 }
   0xd   :  { %28 = vsyncpa [#allocation21], 0 }
   0xe   :  { %29 = vsyncpa [#allocation24], 0 }
   0xf   :  { %30 = vsyncpa [#allocation4], 0 }
  0x10   :  { %32 = vsyncpa [#allocation4 + $0x1], 0  ;;  %s3165_s18 = smov 0   ;;  %s3167_s19 = smov 0  }
  0x11   :  { %s3169_s20 = smov 0   ;;  %s3171_s21 = smov 0  }
  0x12 LB: > { %3862 = sst [smem:[#allocation36_spill]] %s3048_s18  ;;  %s3062_s22 = smov [#allocation5]   ;;  %s3060_s21 = sphi %s3171_s21, %s3917_s21   ;;  %s3056_s20 = sphi %s3169_s20, %s3916_s20   ;;  %s3052_s19 = sphi %s3167_s19, %s3913_s19   ;;  %s3048_s18 = sphi %s3165_s18, %s3915_s18  }
  0x13   : > { %3863 = sst [smem:[#allocation37_spill]] %s3052_s19  ;;  %s401_s23 = sshll.u32 %s3062_s22, 4  ;;  %s3191_s23 = int_to_ptr.vmem [resolvable:$true] %s401_s23 }
  0x14   : > { %3864 = sst [smem:[#allocation38_spill]] %s3056_s20  ;;  %s3186_s24 = sadd.s32 4294967295, %s3060_s21  }
  0x15   : > { %3865 = sst [smem:[#allocation39_spill]] %s3186_s24  ;;  %p2024_p0 = scmp.ge.s32.totalorder %s3060_s21, 1 }
  0x16   : > { %p3848_p1 = scmp.eq.s32.totalorder %s3186_s24, 0  ;;  %p389_p2 = scmp.lt.s32.totalorder %s3060_s21, 3 }
  0x17   : > { %s3063_s26 = smov [#allocation8]   ;;  %s3064_s29 = smov [#allocation11]  }
  0x18   : > { %p3193_p3 = pnand %p2024_p0, %p389_p2  ;;  %s427_s27 = sshll.u32 %s3063_s26, 4  ;;  %s3206_s27 = int_to_ptr.vmem [resolvable:$true] %s427_s27 }
  0x19   : > { %s453_s30 = sshll.u32 %s3064_s29, 4  ;;  %s3869_s1 = sld [smem:[#allocation42_spill]]  ;;  %s3208_s30 = int_to_ptr.vmem [resolvable:$true] %s453_s30 }
  0x1a   : > { %s3866_s25 = scalar_select %p3193_p3, 1, 0 }
  0x1b   : > { %p2358_p5 = pneg %p3193_p3 }
  0x1c   : > { %3867 = sst [smem:[#allocation40_spill]] %s3866_s25 }
  0x1d   : > { %p3202_p6 = pnand %p2358_p5, %p3848_p1 }
  0x1f   : > { %s2544_s22 = scalar_lea.hbm %s3869_s1, 512  ;;  %p3218_p8 = pneg %p3202_p6 }
  0x20   : > { %p2545_p7 = scmp.ne.s32.totalorder %s3869_s1, %s2544_s22  ;;  %p2551_p11 = scmp.lt.u32.totalorder %s2544_s22, %s3869_s1 }
  0x22   : > { %p2547_p9 = pnand %p3218_p8, %p2545_p7 }
  0x24   : > { %p2548_p10 = pneg %p2547_p9 }
  0x26   : > { %p2553_p12 = pnand %p2551_p11, %p2548_p10 }
  0x28   : > { %2556 = shalt.err (!%p2553_p12)
}
  0x29   : > { %s2557_s15 = scalar_lea.vmem %s3191_s23, 512  ;;  %p2565_p5 = scmp.lt.s32.totalorder %s3191_s23, %s3191_s23 }
  0x2a   : > { %p2558_p13 = scmp.ne.s32.totalorder %s3191_s23, %s2557_s15  ;;  %p2566_p4 = scmp.lt.s32.totalorder %s2557_s15, %s2557_s15 }
  0x2c   : > { %p2560_p0 = pnand %p2558_p13, %p3218_p8  ;;  %p2567_p7 = por %p2566_p4, %p2565_p5 }
  0x2e   : > { %p2561_p2 = pneg %p2560_p0 }
  0x30   : > { %p2568_p9 = pnand %p2567_p7, %p2561_p2 }
  0x32   : > { %2571 = shalt.err (!%p2568_p9)
}
  0x33   : > { %s3854_s25 = smov 64   ;;  %s3855_s0 = smov 4  }
  0x34   : > { %2361 = dma.hbm_to_vmem [thread:$0]  (!%p3202_p6), %s3869_s1, 512, %s3191_s23, [#allocation6], %s3854_s25, %s3854_s25, %s3855_s0  }
  0x35   : > { %s3871_s3 = sld [smem:[#allocation44_spill]] }
  0x3b   : > { %s2572_s15 = scalar_lea.hbm %s3871_s3, 128 }
  0x3c   : > { %p2573_p4 = scmp.ne.s32.totalorder %s3871_s3, %s2572_s15  ;;  %p2579_p12 = scmp.lt.u32.totalorder %s2572_s15, %s3871_s3 }
  0x3e   : > { %p2575_p10 = pnand %p2573_p4, %p3218_p8 }
  0x40   : > { %p2576_p11 = pneg %p2575_p10 }
  0x42   : > { %p2581_p13 = pnand %p2579_p12, %p2576_p11 }
  0x44   : > { %2584 = shalt.err (!%p2581_p13)
}
  0x45   : > { %s2585_s23 = scalar_lea.vmem %s3206_s27, 128  ;;  %p2593_p7 = scmp.lt.s32.totalorder %s3206_s27, %s3206_s27 }
  0x46   : > { %p2586_p0 = scmp.ne.s32.totalorder %s3206_s27, %s2585_s23  ;;  %p2594_p9 = scmp.lt.s32.totalorder %s2585_s23, %s2585_s23 }
  0x48   : > { %p2588_p2 = pnand %p2586_p0, %p3218_p8  ;;  %p2595_p4 = por %p2594_p9, %p2593_p7 }
  0x4a   : > { %p2589_p5 = pneg %p2588_p2 }
  0x4c   : > { %p2596_p10 = pnand %p2595_p4, %p2589_p5 }
  0x4e   : > { %2599 = shalt.err (!%p2596_p10)
}
  0x4f   : > { %2367 = dma.hbm_to_vmem [thread:$0]  (!%p3202_p6), %s3871_s3, 128, %s3206_s27, [#allocation9], %s3854_s25, %s3854_s25, %s3855_s0  }
  0x50   : > { %s2600_s16 = scalar_lea.hbm %s3829_s5, 2048 }
  0x51   : > { %p2601_p11 = scmp.ne.s32.totalorder %s3829_s5, %s2600_s16  ;;  %p2607_p0 = scmp.lt.u32.totalorder %s2600_s16, %s3829_s5 }
  0x53   : > { %p2603_p12 = pnand %p2601_p11, %p3218_p8 }
  0x55   : > { %p2604_p13 = pneg %p2603_p12 }
  0x57   : > { %p2609_p2 = pnand %p2607_p0, %p2604_p13 }
  0x59   : > { %2612 = shalt.err (!%p2609_p2)
}
  0x5a   : > { %s2613_s27 = scalar_lea.vmem %s3208_s30, 2048  ;;  %p2621_p4 = scmp.lt.s32.totalorder %s3208_s30, %s3208_s30 }
  0x5b   : > { %p2614_p5 = scmp.ne.s32.totalorder %s3208_s30, %s2613_s27  ;;  %p2622_p10 = scmp.lt.s32.totalorder %s2613_s27, %s2613_s27 }
  0x5d   : > { %p2616_p7 = pnand %p2614_p5, %p3218_p8  ;;  %p2623_p11 = por %p2622_p10, %p2621_p4 }
  0x5f   : > { %p2617_p9 = pneg %p2616_p7 }
  0x61   : > { %p2624_p12 = pnand %p2623_p11, %p2617_p9 }
  0x63   : > { %2627 = shalt.err (!%p2624_p12)
}
  0x64   : > { %2373 = dma.hbm_to_vmem [thread:$0]  (!%p3202_p6), %s3829_s5, 2048, %s3208_s30, [#allocation12], %s3854_s25, %s3854_s25, %s3855_s0  }
  0x65   : > { %s3067_s19 = smov [#allocation14]   ;;  %s3068_s24 = smov [#allocation17]  }
  0x66   : > { %s479_s20 = sshll.u32 %s3067_s19, 4  ;;  %s505_s16 = sshll.u32 %s3068_s24, 4  ;;  %s480_s20 = int_to_ptr.vmem [resolvable:$true] %s479_s20  ;;  %s506_s16 = int_to_ptr.vmem [resolvable:$true] %s505_s16 }
  0x67   : > { %s2628_s29 = scalar_lea.hbm %s3831_s7, 32 }
  0x68   : > { %p2629_p13 = scmp.ne.s32.totalorder %s3831_s7, %s2628_s29  ;;  %p2635_p5 = scmp.lt.u32.totalorder %s2628_s29, %s3831_s7 }
  0x6a   : > { %p2631_p0 = pnand %p2629_p13, %p3218_p8 }
  0x6c   : > { %p2632_p2 = pneg %p2631_p0 }
  0x6e   : > { %p2637_p7 = pnand %p2635_p5, %p2632_p2 }
  0x70   : > { %2640 = shalt.err (!%p2637_p7)
}
  0x71   : > { %s2641_s30 = scalar_lea.vmem %s480_s20, 32  ;;  %p2649_p11 = scmp.lt.s32.totalorder %s480_s20, %s480_s20 }
  0x72   : > { %p2642_p9 = scmp.ne.s32.totalorder %s480_s20, %s2641_s30  ;;  %p2650_p12 = scmp.lt.s32.totalorder %s2641_s30, %s2641_s30 }
  0x74   : > { %p2644_p4 = pnand %p2642_p9, %p3218_p8  ;;  %p2651_p1 = por %p2650_p12, %p2649_p11 }
  0x76   : > { %p2645_p10 = pneg %p2644_p4 }
  0x78   : > { %p2652_p3 = pnand %p2651_p1, %p2645_p10 }
  0x7a   : > { %2655 = shalt.err (!%p2652_p3)
}
  0x7b   : > { %s3850_s18 = smov 16   ;;  %s3852_s19 = smov 1  }
  0x7c   : > { %2379 = dma.hbm_to_vmem [thread:$0]  (!%p3202_p6), %s3831_s7, 32, %s480_s20, [#allocation15], %s3850_s18, %s3850_s18, %s3852_s19  }
  0x7d   : > { %s2656_s29 = scalar_lea.hbm %s3833_s9, 512 }
  0x7e   : > { %p2657_p1 = scmp.ne.s32.totalorder %s3833_s9, %s2656_s29  ;;  %p2663_p0 = scmp.lt.u32.totalorder %s2656_s29, %s3833_s9 }
  0x80   : > { %p2659_p3 = pnand %p2657_p1, %p3218_p8 }
  0x82   : > { %p2660_p13 = pneg %p2659_p3 }
  0x84   : > { %p2665_p2 = pnand %p2663_p0, %p2660_p13 }
  0x86   : > { %2668 = shalt.err (!%p2665_p2)
}
  0x87   : > { %s2669_s1 = scalar_lea.vmem %s506_s16, 512  ;;  %p2677_p4 = scmp.lt.s32.totalorder %s506_s16, %s506_s16 }
  0x88   : > { %p2670_p5 = scmp.ne.s32.totalorder %s506_s16, %s2669_s1  ;;  %p2678_p10 = scmp.lt.s32.totalorder %s2669_s1, %s2669_s1 }
  0x8a   : > { %p2672_p7 = pnand %p2670_p5, %p3218_p8  ;;  %p2679_p11 = por %p2678_p10, %p2677_p4 }
  0x8c   : > { %p2673_p9 = pneg %p2672_p7 }
  0x8e   : > { %p2680_p12 = pnand %p2679_p11, %p2673_p9 }
  0x90   : > { %2683 = shalt.err (!%p2680_p12)
}
  0x91   : > { %2385 = dma.hbm_to_vmem [thread:$0]  (!%p3202_p6), %s3833_s9, 512, %s506_s16, [#allocation18], %s3854_s25, %s3854_s25, %s3855_s0  }
  0x92   : > { %s3071_s17 = smov [#allocation20]   ;;  %s3072_s29 = smov [#allocation23]  }
  0x93   : > { %s531_s22 = sshll.u32 %s3071_s17, 4  ;;  %s557_s15 = sshll.u32 %s3072_s29, 4  ;;  %s532_s22 = int_to_ptr.vmem [resolvable:$true] %s531_s22  ;;  %s558_s15 = int_to_ptr.vmem [resolvable:$true] %s557_s15 }
  0x94   : > { %s2684_s30 = scalar_lea.hbm %s3835_s11, 2048 }
  0x95   : > { %p2685_p1 = scmp.ne.s32.totalorder %s3835_s11, %s2684_s30  ;;  %p2691_p0 = scmp.lt.u32.totalorder %s2684_s30, %s3835_s11 }
  0x97   : > { %p2687_p3 = pnand %p2685_p1, %p3218_p8 }
  0x99   : > { %p2688_p13 = pneg %p2687_p3 }
  0x9b   : > { %p2693_p2 = pnand %p2691_p0, %p2688_p13 }
  0x9d   : > { %2696 = shalt.err (!%p2693_p2)
}
  0x9e   : > { %s2697_s16 = scalar_lea.vmem %s532_s22, 2048  ;;  %p2705_p4 = scmp.lt.s32.totalorder %s532_s22, %s532_s22 }
  0x9f   : > { %p2698_p5 = scmp.ne.s32.totalorder %s532_s22, %s2697_s16  ;;  %p2706_p10 = scmp.lt.s32.totalorder %s2697_s16, %s2697_s16 }
  0xa1   : > { %p2700_p7 = pnand %p2698_p5, %p3218_p8  ;;  %p2707_p11 = por %p2706_p10, %p2705_p4 }
  0xa3   : > { %p2701_p9 = pneg %p2700_p7 }
  0xa5   : > { %p2708_p12 = pnand %p2707_p11, %p2701_p9 }
  0xa7   : > { %2711 = shalt.err (!%p2708_p12)
}
  0xa8   : > { %2391 = dma.hbm_to_vmem [thread:$0]  (!%p3202_p6), %s3835_s11, 2048, %s532_s22, [#allocation21], %s3854_s25, %s3854_s25, %s3855_s0  }
  0xa9   : > { %s2712_s29 = scalar_lea.hbm %s3837_s13, 32 }
  0xaa   : > { %p2713_p1 = scmp.ne.s32.totalorder %s3837_s13, %s2712_s29  ;;  %p2719_p0 = scmp.lt.u32.totalorder %s2712_s29, %s3837_s13 }
  0xac   : > { %p2715_p3 = pnand %p2713_p1, %p3218_p8 }
  0xae   : > { %p2716_p13 = pneg %p2715_p3 }
  0xb0   : > { %p2721_p2 = pnand %p2719_p0, %p2716_p13 }
  0xb2   : > { %2724 = shalt.err (!%p2721_p2)
}
  0xb3   : > { %s2725_s20 = scalar_lea.vmem %s558_s15, 32  ;;  %p2733_p4 = scmp.lt.s32.totalorder %s558_s15, %s558_s15 }
  0xb4   : > { %p2726_p5 = scmp.ne.s32.totalorder %s558_s15, %s2725_s20  ;;  %p2734_p10 = scmp.lt.s32.totalorder %s2725_s20, %s2725_s20 }
  0xb6   : > { %p2728_p7 = pnand %p2726_p5, %p3218_p8  ;;  %p2735_p11 = por %p2734_p10, %p2733_p4 }
  0xb8   : > { %p2729_p9 = pneg %p2728_p7 }
  0xba   : > { %p2736_p12 = pnand %p2735_p11, %p2729_p9 }
  0xbc   : > { %2739 = shalt.err (!%p2736_p12)
}
  0xbd   : > { %s3872_s22 = smov 1   ;;  %s3873_s16 = smov 16  }
  0xbe   : > { %2397 = dma.hbm_to_vmem [thread:$0]  (!%p3202_p6), %s3837_s13, 32, %s558_s15, [#allocation24], %s3873_s16, %s3873_s16, %s3872_s22  }
  0xbf   : > { %s3073_s24 = smov [#allocation7]   ;;  %s3074_s29 = smov [#allocation10]  }
  0xc0   : > { %s414_s17 = sshll.u32 %s3073_s24, 4  ;;  %s440_s27 = sshll.u32 %s3074_s29, 4  ;;  %s415_s17 = int_to_ptr.vmem [resolvable:$true] %s414_s17  ;;  %s441_s27 = int_to_ptr.vmem [resolvable:$true] %s440_s27 }
  0xc1   : > { %s3874_s2 = sld [smem:[#allocation43_spill]] }
  0xc7   : > { %s2740_s1 = scalar_lea.hbm %s3874_s2, 32 }
  0xc8   : > { %p2741_p1 = scmp.ne.s32.totalorder %s3874_s2, %s2740_s1  ;;  %p2747_p0 = scmp.lt.u32.totalorder %s2740_s1, %s3874_s2 }
  0xca   : > { %p2743_p3 = pnand %p2741_p1, %p3218_p8 }
  0xcc   : > { %p2744_p13 = pneg %p2743_p3 }
  0xce   : > { %p2749_p2 = pnand %p2747_p0, %p2744_p13 }
  0xd0   : > { %2752 = shalt.err (!%p2749_p2)
}
  0xd1   : > { %s2753_s15 = scalar_lea.vmem %s415_s17, 32  ;;  %p2761_p4 = scmp.lt.s32.totalorder %s415_s17, %s415_s17 }
  0xd2   : > { %p2754_p5 = scmp.ne.s32.totalorder %s415_s17, %s2753_s15  ;;  %p2762_p10 = scmp.lt.s32.totalorder %s2753_s15, %s2753_s15 }
  0xd4   : > { %p2756_p7 = pnand %p2754_p5, %p3218_p8  ;;  %p2763_p11 = por %p2762_p10, %p2761_p4 }
  0xd6   : > { %p2757_p9 = pneg %p2756_p7 }
  0xd8   : > { %p2764_p12 = pnand %p2763_p11, %p2757_p9 }
  0xda   : > { %2767 = shalt.err (!%p2764_p12)
}
  0xdb   : > { %2364 = dma.hbm_to_vmem [thread:$0]  (!%p3202_p6), %s3874_s2, 32, %s415_s17, [#allocation6], %s3873_s16, %s3873_s16, %s3872_s22  }
  0xdc   : > { %s2768_s29 = scalar_lea.hbm %s3828_s4, 128 }
  0xdd   : > { %p2769_p1 = scmp.ne.s32.totalorder %s3828_s4, %s2768_s29  ;;  %p2775_p0 = scmp.lt.u32.totalorder %s2768_s29, %s3828_s4 }
  0xdf   : > { %p2771_p3 = pnand %p2769_p1, %p3218_p8 }
  0xe1   : > { %p2772_p13 = pneg %p2771_p3 }
  0xe3   : > { %p2777_p2 = pnand %p2775_p0, %p2772_p13 }
  0xe5   : > { %2780 = shalt.err (!%p2777_p2)
}
  0xe6   : > { %s2781_s18 = scalar_lea.vmem %s441_s27, 128  ;;  %p2789_p4 = scmp.lt.s32.totalorder %s441_s27, %s441_s27 }
  0xe7   : > { %p2782_p5 = scmp.ne.s32.totalorder %s441_s27, %s2781_s18  ;;  %p2790_p10 = scmp.lt.s32.totalorder %s2781_s18, %s2781_s18 }
  0xe9   : > { %p2784_p7 = pnand %p2782_p5, %p3218_p8  ;;  %p2791_p11 = por %p2790_p10, %p2789_p4 }
  0xeb   : > { %p2785_p9 = pneg %p2784_p7 }
  0xed   : > { %p2792_p12 = pnand %p2791_p11, %p2785_p9 }
  0xef   : > { %2795 = shalt.err (!%p2792_p12)
}
  0xf0   : > { %s3875_s17 = smov 4   ;;  %s3876_s15 = smov 64  }
  0xf1   : > { %2370 = dma.hbm_to_vmem [thread:$0]  (!%p3202_p6), %s3828_s4, 128, %s441_s27, [#allocation9], %s3876_s15, %s3876_s15, %s3875_s17  }
  0xf2   : > { %s3075_s19 = smov [#allocation13]   ;;  %s3076_s29 = smov [#allocation16]  }
  0xf3   : > { %s466_s24 = sshll.u32 %s3075_s19, 4  ;;  %s492_s23 = sshll.u32 %s3076_s29, 4  ;;  %s467_s24 = int_to_ptr.vmem [resolvable:$true] %s466_s24  ;;  %s493_s23 = int_to_ptr.vmem [resolvable:$true] %s492_s23 }
  0xf4   : > { %s2796_s20 = scalar_lea.hbm %s3830_s6, 32 }
  0xf5   : > { %p2797_p1 = scmp.ne.s32.totalorder %s3830_s6, %s2796_s20  ;;  %p2803_p0 = scmp.lt.u32.totalorder %s2796_s20, %s3830_s6 }
  0xf7   : > { %p2799_p3 = pnand %p2797_p1, %p3218_p8 }
  0xf9   : > { %p2800_p13 = pneg %p2799_p3 }
  0xfb   : > { %p2805_p2 = pnand %p2803_p0, %p2800_p13 }
  0xfd   : > { %2808 = shalt.err (!%p2805_p2)
}
  0xfe   : > { %s2809_s27 = scalar_lea.vmem %s467_s24, 32  ;;  %p2817_p4 = scmp.lt.s32.totalorder %s467_s24, %s467_s24 }
  0xff   : > { %p2810_p5 = scmp.ne.s32.totalorder %s467_s24, %s2809_s27  ;;  %p2818_p10 = scmp.lt.s32.totalorder %s2809_s27, %s2809_s27 }
 0x101   : > { %p2812_p7 = pnand %p2810_p5, %p3218_p8  ;;  %p2819_p11 = por %p2818_p10, %p2817_p4 }
 0x103   : > { %p2813_p9 = pneg %p2812_p7 }
 0x105   : > { %p2820_p12 = pnand %p2819_p11, %p2813_p9 }
 0x107   : > { %2823 = shalt.err (!%p2820_p12)
}
 0x108   : > { %2376 = dma.hbm_to_vmem [thread:$0]  (!%p3202_p6), %s3830_s6, 32, %s467_s24, [#allocation12], %s3873_s16, %s3873_s16, %s3872_s22  }
 0x109   : > { %s2824_s0 = scalar_lea.hbm %s3832_s8, 32 }
 0x10a   : > { %p2825_p1 = scmp.ne.s32.totalorder %s3832_s8, %s2824_s0  ;;  %p2831_p0 = scmp.lt.u32.totalorder %s2824_s0, %s3832_s8 }
 0x10c   : > { %p2827_p3 = pnand %p2825_p1, %p3218_p8 }
 0x10e   : > { %p2828_p13 = pneg %p2827_p3 }
 0x110   : > { %p2833_p2 = pnand %p2831_p0, %p2828_p13 }
 0x112   : > { %2836 = shalt.err (!%p2833_p2)
}
 0x113   : > { %s2837_s20 = scalar_lea.vmem %s493_s23, 32  ;;  %p2845_p4 = scmp.lt.s32.totalorder %s493_s23, %s493_s23 }
 0x114   : > { %p2838_p5 = scmp.ne.s32.totalorder %s493_s23, %s2837_s20  ;;  %p2846_p10 = scmp.lt.s32.totalorder %s2837_s20, %s2837_s20 }
 0x116   : > { %p2840_p7 = pnand %p2838_p5, %p3218_p8  ;;  %p2847_p11 = por %p2846_p10, %p2845_p4 }
 0x118   : > { %p2841_p9 = pneg %p2840_p7 }
 0x11a   : > { %p2848_p12 = pnand %p2847_p11, %p2841_p9 }
 0x11c   : > { %2851 = shalt.err (!%p2848_p12)
}
 0x11d   : > { %2382 = dma.hbm_to_vmem [thread:$0]  (!%p3202_p6), %s3832_s8, 32, %s493_s23, [#allocation15], %s3873_s16, %s3873_s16, %s3872_s22  }
 0x11e   : > { %s3077_s25 = smov [#allocation19]   ;;  %s3078_s2 = smov [#allocation22]  }
 0x11f   : > { %s518_s27 = sshll.u32 %s3077_s25, 4  ;;  %s544_s3 = sshll.u32 %s3078_s2, 4  ;;  %s519_s27 = int_to_ptr.vmem [resolvable:$true] %s518_s27  ;;  %s545_s3 = int_to_ptr.vmem [resolvable:$true] %s544_s3 }
 0x120   : > { %s2852_s0 = scalar_lea.hbm %s3834_s10, 32 }
 0x121   : > { %p2853_p1 = scmp.ne.s32.totalorder %s3834_s10, %s2852_s0  ;;  %p2859_p0 = scmp.lt.u32.totalorder %s2852_s0, %s3834_s10 }
 0x123   : > { %p2855_p3 = pnand %p2853_p1, %p3218_p8 }
 0x125   : > { %p2856_p13 = pneg %p2855_p3 }
 0x127   : > { %p2861_p2 = pnand %p2859_p0, %p2856_p13 }
 0x129   : > { %2864 = shalt.err (!%p2861_p2)
}
 0x12a   : > { %s2865_s23 = scalar_lea.vmem %s519_s27, 32  ;;  %p2873_p4 = scmp.lt.s32.totalorder %s519_s27, %s519_s27 }
 0x12b   : > { %p2866_p5 = scmp.ne.s32.totalorder %s519_s27, %s2865_s23  ;;  %p2874_p10 = scmp.lt.s32.totalorder %s2865_s23, %s2865_s23 }
 0x12d   : > { %p2868_p7 = pnand %p2866_p5, %p3218_p8  ;;  %p2875_p11 = por %p2874_p10, %p2873_p4 }
 0x12f   : > { %p2869_p9 = pneg %p2868_p7 }
 0x131   : > { %p2876_p12 = pnand %p2875_p11, %p2869_p9 }
 0x133   : > { %2879 = shalt.err (!%p2876_p12)
}
 0x134   : > { %2388 = dma.hbm_to_vmem [thread:$0]  (!%p3202_p6), %s3834_s10, 32, %s519_s27, [#allocation18], %s3873_s16, %s3873_s16, %s3872_s22  }
 0x135   : > { %s2880_s2 = scalar_lea.hbm %s3836_s12, 32 }
 0x136   : > { %p2881_p1 = scmp.ne.s32.totalorder %s3836_s12, %s2880_s2  ;;  %p2887_p0 = scmp.lt.u32.totalorder %s2880_s2, %s3836_s12 }
 0x138   : > { %p2883_p3 = pnand %p2881_p1, %p3218_p8 }
 0x13a   : > { %p2884_p13 = pneg %p2883_p3 }
 0x13c   : > { %p2889_p2 = pnand %p2887_p0, %p2884_p13 }
 0x13e   : > { %2892 = shalt.err (!%p2889_p2)
}
 0x13f   : > { %s2893_s29 = scalar_lea.vmem %s545_s3, 32  ;;  %p2901_p4 = scmp.lt.s32.totalorder %s545_s3, %s545_s3 }
 0x140   : > { %p2894_p5 = scmp.ne.s32.totalorder %s545_s3, %s2893_s29  ;;  %p2902_p10 = scmp.lt.s32.totalorder %s2893_s29, %s2893_s29 }
 0x142   : > { %p2896_p7 = pnand %p2894_p5, %p3218_p8  ;;  %p2903_p11 = por %p2902_p10, %p2901_p4 }
 0x144   : > { %p2897_p9 = pneg %p2896_p7 }
 0x146   : > { %p2904_p12 = pnand %p2903_p11, %p2897_p9 }
 0x148   : > { %2907 = shalt.err (!%p2904_p12)
}
 0x149   : > { %2394 = dma.hbm_to_vmem [thread:$0]  (!%p3202_p6), %s3836_s12, 32, %s545_s3, [#allocation21], %s3873_s16, %s3873_s16, %s3872_s22  }
 0x14a   : > { %s3079_s1 = smov [#allocation25]   ;;  %s2908_s18 = scalar_lea.hbm %s3838_s14, 32 }
 0x14b   : > { %s570_s23 = sshll.u32 %s3079_s1, 4  ;;  %p2909_p1 = scmp.ne.s32.totalorder %s3838_s14, %s2908_s18  ;;  %s571_s23 = int_to_ptr.vmem [resolvable:$true] %s570_s23 }
 0x14c   : > { %p2915_p0 = scmp.lt.u32.totalorder %s2908_s18, %s3838_s14 }
 0x14d   : > { %p2911_p3 = pnand %p2909_p1, %p3218_p8 }
 0x14f   : > { %p2912_p13 = pneg %p2911_p3 }
 0x151   : > { %p2917_p2 = pnand %p2915_p0, %p2912_p13 }
 0x153   : > { %2920 = shalt.err (!%p2917_p2)
}
 0x154   : > { %s2921_s3 = scalar_lea.vmem %s571_s23, 32  ;;  %p2929_p4 = scmp.lt.s32.totalorder %s571_s23, %s571_s23 }
 0x155   : > { %p2922_p5 = scmp.ne.s32.totalorder %s571_s23, %s2921_s3  ;;  %p2930_p10 = scmp.lt.s32.totalorder %s2921_s3, %s2921_s3 }
 0x157   : > { %p2924_p7 = pnand %p2922_p5, %p3218_p8  ;;  %p2931_p11 = por %p2930_p10, %p2929_p4 }
 0x159   : > { %p2925_p9 = pneg %p2924_p7 }
 0x15b   : > { %p2932_p12 = pnand %p2931_p11, %p2925_p9 }
 0x15d   : > { %2935 = shalt.err (!%p2932_p12)
}
 0x15e   : > { %s3877_s29 = sld [smem:[#allocation38_spill]]  ;;  %s3878_s26 = sld [smem:[#allocation37_spill]] }
 0x15f   : > { %s3879_s27 = sld [smem:[#allocation36_spill]]  ;;  %s3880_s30 = sld [smem:[#allocation39_spill]] }
 0x160   : > { %2400 = dma.hbm_to_vmem [thread:$0]  (!%p3202_p6), %s3838_s14, 32, %s571_s23, [#allocation24], %s3873_s16, %s3873_s16, %s3872_s22  }
 0x161   : > { %s2023_s28 = sadd.s32 4294967294, %s3060_s21   ;;  %s3527_s1 = sadd.s32 1, %s3060_s21  }
 0x162   : > { %s42_s20 = ssub.s32 %s3060_s21, %s3527_s1  ;;  %p53_p3 = scmp.eq.s32.totalorder %s3060_s21, 0 }
 0x163   : > { %p43_p8 = scmp.eq.s32.totalorder %s42_s20, 0  ;;  %p382_p7 = scmp.eq.s32.totalorder %s2023_s28, 1 }
 0x164   : > { %s45_s24 = sadd.s32 1, %s3877_s29  ;;  %p52_p1 = scmp.ne.s32.totalorder %s3877_s29, %s3878_s26 }
 0x165   : > { %p58_p13 = scmp.ne.s32.totalorder %s3878_s26, %s3879_s27  ;;  %p3882_p2 = scmp.eq.s32.totalorder %s3880_s30, 0 }
 0x166   : > { %s3538_s18 = scalar_select %p43_p8, %s3877_s29, %s45_s24  }
 0x167   : > { %p3540_p0 = por %p53_p3, %p52_p1  ;;  %p3546_p6 = por %p3882_p2, %p58_p13 }
 0x168   : > { %p376_p5 = scmp.eq.s32.totalorder %s3880_s30, 1  ;;  %p2423_p9 = scmp.lt.s32.totalorder %s3060_s21, 2 }
 0x169   : > { %s584_s16 = sand.u32 1, %s3877_s29   ;;  %p3557_p10 = por %p382_p7, %p58_p13 }
 0x16a   : > { %p3553_p4 = por %p376_p5, %p52_p1  ;;  %s2040_s17 = sshll.u32 %s584_s16, 3 }
 0x16b   : > { %s3885_s2 = scalar_select %p3557_p10, 1, 0 }
 0x16c   : > { %s3884_s23 = scalar_select %p3553_p4, 1, 0 }
 0x16d   : > { %s2041_s15 = sshll.u32 %s3060_s21, 7  ;;  %s3886_s19 = sld [smem:[#allocation41_spill]] }
 0x16e   : > { %s588_s29 = scalar_lea.vmem [#allocation2], %s2040_s17  ;;  %p3571_p11 = pnand %p2423_p9, %p3540_p0 }
 0x16f   : > { %s595_s30 = sshll.u32 %s588_s29, 4  ;;  %s585_s20 = scalar_lea.sflag [#allocation3], %s584_s16  ;;  %s3567_s30 = int_to_ptr.vmem [resolvable:$true] %s595_s30 }
 0x170   : > { %p2938_p8 = pneg %p3571_p11 }
 0x173   : > { %s3887_s26 = smov %s3886_s19  ;;  %s3565_s27 = scalar_lea.hbm %s3886_s19, %s2041_s15 }
 0x174   : > { %s2936_s24 = scalar_lea.hbm %s3565_s27, 128  ;;  %s2941_s3 = scalar_lea.hbm %s3887_s26, 256 }
 0x175   : > { %p2937_p12 = scmp.ne.s32.totalorder %s3565_s27, %s2936_s24  ;;  %p2942_p13 = scmp.lt.u32.totalorder %s3565_s27, %s3887_s26 }
 0x176   : > { %p2943_p0 = scmp.lt.u32.totalorder %s2941_s3, %s2936_s24  ;;  %p2945_p5 = scmp.lt.u32.totalorder %s2936_s24, %s3565_s27 }
 0x177   : > { %p2939_p1 = pnand %p2938_p8, %p2937_p12 }
 0x178   : > { %p2944_p2 = por %p2943_p0, %p2942_p13 }
 0x179   : > { %p2940_p3 = pneg %p2939_p1 }
 0x17a   : > { %p2946_p7 = por %p2945_p5, %p2944_p2 }
 0x17c   : > { %p2947_p9 = pnand %p2946_p7, %p2940_p3 }
 0x17e   : > { %2950 = shalt.err (!%p2947_p9)
}
 0x17f   : > { %s2951_s16 = scalar_lea.vmem %s3567_s30, 128  ;;  %s3080_s19 = smov [#allocation2]  }
 0x180   : > { %p2952_p12 = scmp.ne.s32.totalorder %s3567_s30, %s2951_s16  ;;  %s2956_s29 = sshll.u32 %s3080_s19, 4  ;;  %s2957_s29 = int_to_ptr.vmem [resolvable:$false] %s2956_s29 }
 0x181   : > { %s2958_s17 = scalar_lea.vmem %s2957_s29, 256  ;;  %p2959_p4 = scmp.lt.s32.totalorder %s3567_s30, %s2957_s29 }
 0x182   : > { %p2954_p1 = pnand %p2952_p12, %p2938_p8  ;;  %p2960_p13 = scmp.lt.s32.totalorder %s2958_s17, %s2951_s16 }
 0x184   : > { %p2955_p10 = pneg %p2954_p1  ;;  %p2961_p0 = por %p2960_p13, %p2959_p4 }
 0x186   : > { %p2962_p2 = pnand %p2961_p0, %p2955_p10 }
 0x188   : > { %2965 = shalt.err (!%p2962_p2)
}
 0x189   : > { %2404 = dma.hbm_to_vmem [thread:$0]  (!%p3571_p11), %s3565_s27, 128, %s3567_s30, %s585_s20  }
 0x18a   : > { %s3889_s24 = sld [smem:[#allocation40_spill]] }
 0x190   : > { %p3890_p3 = scmp.ne.s32.totalorder %s3889_s24, 0 }
 0x191   : > { %s3891_s15 = sld [smem:[#allocation37_spill]] (!%p3890_p3) }
 0x192   : > { %604 = sbr.rel (%p3890_p3) target bundleno = 4951 (0x1357), region = 80 }
 0x197   : > { %s3603_s3 = sand.u32 (!%p3890_p3), 1, %s3891_s15  }
 0x198   : > { %s2043_s25 = sshll.u32 (!%p3890_p3), %s3603_s3, 3  ;;  %s607_s0 = scalar_lea.sflag (!%p3890_p3), [#allocation3], %s3603_s3 }
 0x199   : > { %s610_s16 = scalar_lea.vmem [#allocation2], %s2043_s25 }
 0x19a   : > { %3011 = dma.done.wait (%p3546_p6), %s607_s0, 128  }
 0x19b   : > { %3013 = vsyncadd (%p3546_p6), %s607_s0, 4294967168  ;;  %s3892_s27 = sld [smem:[#allocation39_spill]] }
 0x1a1   : > { %p3893_p4 = scmp.eq.s32.totalorder %s3892_s27, 0 }
 0x1a3   : > { %3015 = dma.done.wait (%p3893_p4), [#allocation6], 544   ;;  %p3894_p10 = pmov %p3893_p4 }
 0x1a4   : > { %p3895_p11 = pmov %p3893_p4 }
 0x1a5   : > { %3017 = vsyncadd (%p3894_p10), [#allocation6], 4294966752 }
 0x1a6   : > { %3019 = dma.done.wait (%p3895_p11), [#allocation9], 256   ;;  %p3896_p8 = pmov %p3893_p4 }
 0x1a7   : > { %p3897_p5 = pmov %p3893_p4 }
 0x1a8   : > { %3021 = vsyncadd (%p3896_p8), [#allocation9], 4294967040 }
 0x1a9   : > { %3023 = dma.done.wait (%p3897_p5), [#allocation12], 2080   ;;  %p3898_p7 = pmov %p3893_p4 }
 0x1aa   : > { %p3899_p6 = pmov %p3893_p4 }
 0x1ab   : > { %3025 = vsyncadd (%p3898_p7), [#allocation12], 4294965216 }
 0x1ac   : > { %3027 = dma.done.wait (%p3899_p6), [#allocation15], 64   ;;  %p3900_p9 = pmov %p3893_p4 }
 0x1ad   : > { %p3901_p12 = pmov %p3893_p4 }
 0x1ae   : > { %3029 = vsyncadd (%p3900_p9), [#allocation15], 4294967232 }
 0x1af   : > { %3031 = dma.done.wait (%p3901_p12), [#allocation18], 544   ;;  %p3902_p1 = pmov %p3893_p4 }
 0x1b1   : > { %3033 = vsyncadd (%p3902_p1), [#allocation18], 4294966752  ;;  %p3903_p13 = pmov %p3902_p1 }
 0x1b2   : > { %p3904_p0 = pmov %p3902_p1 }
 0x1b3   : > { %3035 = dma.done.wait (%p3903_p13), [#allocation21], 2080  }
 0x1b4   : > { %3037 = vsyncadd (%p3904_p0), [#allocation21], 4294965216  ;;  %p3905_p2 = pmov %p3904_p0 }
 0x1b5   : > { %p3906_p3 = pmov %p3904_p0 }
 0x1b6   : > { %3039 = dma.done.wait (%p3905_p2), [#allocation24], 64  }
 0x1b7   : > { %3041 = vsyncadd (%p3906_p3), [#allocation24], 4294967232  ;;  %v3081_v0 = vmov 0.0   ;;  %vm3082_vm0 = vmmov 0   ;;  %v2492_v1 = vld [vmem:[#allocation5] sm:$0xff]   ;;  %v2493_v2 = vld [vmem:[#allocation5 + $0x8] sm:$0xff]   ;;  %v714_v5 = vlaneseq }
 0x1b8   : > { %2186 = vmatprep.subr.bf16.mxu1 %v3081_v0  ;;  %2190 = vmatprep.mubr.msk.bf16.mxu1 %vm3082_vm0, %v3081_v0  ;;  %v3647_v3 = vld [vmem:[%s610_s16] sm:$0xff]  ;;  %vm800_vm1 = vcmask 261120   ;;  %v2062_v8 = vld [vmem:[#allocation7] ss:$0 sm:$0xff]  ;;  %s3083_s22 = smov 64   ;;  %vm848_vm3 = vcmask 1040384  }
 0x1b9   : > { %2214 = vmatprep.subr.bf16.mxu0 %v3081_v0  ;;  %2218 = vmatprep.mubr.msk.bf16.mxu0 %vm3082_vm0, %v3081_v0  ;;  %v781_v4 = vpack.c.bf16 %v3647_v3, %v3647_v3  ;;  %v715_v6 = vshrl.u32 %v714_v5, 7  ;;  %v2066_v18 = vld [vmem:[#allocation8] ss:$0 sm:$0xff]  ;;  %v2067_v19 = vld [vmem:[#allocation10] ss:$0 sm:$0xff]  ;;  %vm879_vm5 = vcmask 1041408  }
 0x1ba   : > { %2187 = vmatpush3.bf16.msra.mxu1 %v2492_v1  ;;  %v2068_v36 = vld [vmem:[#allocation8 + $0x1] ss:$0 sm:$0xff]  ;;  %v2069_v37 = vld [vmem:[#allocation10 + $0x1] ss:$0 sm:$0xff]  ;;  %v2494_v48 = vld [vmem:[#allocation11] sm:$0xff]   ;;  %vm912_vm6 = vcmask 1043456  }
 0x1bb   : > { %2188 = vmatprep.subr.bf16.mxu1 %v3081_v0  ;;  %v3656_v7 = vand.u32 7, %v715_v6  ;;  %v2495_v51 = vld [vmem:[#allocation11 + $0x8] sm:$0xff]   ;;  %v2496_v53 = vld [vmem:[#allocation11 + $0x10] sm:$0xff]   ;;  %v2497_v54 = vld [vmem:[#allocation11 + $0x18] sm:$0xff]   ;;  %vm942_vm8 = vcmask 523264   ;;  %s2135_s30 = sshll.u32 %s3892_s27, 7 }
 0x1bc   : > { %v2498_v55 = vld [vmem:[#allocation11 + $0x20] sm:$0xff]   ;;  %v2499_v56 = vld [vmem:[#allocation11 + $0x28] sm:$0xff]   ;;  %v2500_v57 = vld [vmem:[#allocation11 + $0x30] sm:$0xff]   ;;  %s712_s28 = scalar_lea.vmem [#allocation26], %s2043_s25  ;;  %s3907_s17 = sld [smem:[#allocation45_spill]] }
 0x1bd   : > { %vm717_vm2 = vcmp.ge.s32.totalorder %v3656_v7, 2  ;;  %vm720_vm4 = vcmp.ge.s32.totalorder %v3656_v7, 1  ;;  %v2501_v61 = vld [vmem:[#allocation11 + $0x38] sm:$0xff]   ;;  %v2070_v62 = vld [vmem:[#allocation8 + $0x2] ss:$0 sm:$0xff]  ;;  %vm723_vm7 = vcmp.ge.s32.totalorder %v3656_v7, 4 }
 0x1be   : > { %2189 = vmatpush3.bf16.msra.mxu1 %v2493_v2  ;;  %v3660_v9 = vsel %vm717_vm2, 1.0, %v3081_v0  ;;  %v3668_v26 = vsel %vm720_vm4, 1.0, %v3081_v0  ;;  %v2071_v63 = vld [vmem:[#allocation10 + $0x2] ss:$0 sm:$0xff]  ;;  %s1820_s20 = sshll.u32 %s712_s28, 4  ;;  %s1807_s15 = scalar_lea.sflag [#allocation4], %s3603_s3  ;;  %s3781_s20 = int_to_ptr.vmem [resolvable:$true] %s1820_s20 }
 0x1bf   : > { %2194 = vmatprep.subr.bf16.mxu1 %v3081_v0  ;;  %s2966_s0 = scalar_lea.vmem %s3781_s20, 128  ;;  %p3908_p10 = scmp.ne.s32.totalorder %s3884_s23, 0 }
 0x1c0   : > { %p2967_p4 = scmp.ne.s32.totalorder %s3781_s20, %s2966_s0  ;;  %s3084_s25 = smov [#allocation26]  }
 0x1c1   : > { %2191 = vmatmul.mubr.msk.bf16.vlgmr.msra.gmra.mrb[0].mxu1 %vm800_vm1, %v781_v4  ;;  %s2970_s16 = sshll.u32 %s3084_s25, 4  ;;  %s2971_s16 = int_to_ptr.vmem [resolvable:$false] %s2970_s16 }
 0x1c2   : > { %2210 = vmatprep.mubr.msk.bf16.mxu1 %vm3082_vm0, %v3081_v0  ;;  %2195 = vmatpush3.bf16.msra.mxu1 %v2494_v48  ;;  %v2507_v48 = vld [vmem:[#allocation20 + $0x18] sm:$0xff]   ;;  %s3779_s24 = scalar_lea.hbm %s3907_s17, %s2135_s30  ;;  %p2968_p11 = pnand %p2967_p4, %p3908_p10 }
 0x1c3   : > { %2196 = vmatprep.subr.bf16.mxu1 %v3081_v0  ;;  %s2972_s27 = scalar_lea.vmem %s2971_s16, 256  ;;  %p2973_p5 = scmp.lt.s32.totalorder %s3781_s20, %s2971_s16 }
 0x1c4   : > { %p2969_p8 = pneg %p2968_p11  ;;  %p2974_p7 = scmp.lt.s32.totalorder %s2972_s27, %s2966_s0 }
 0x1c6   : > { %2197 = vmatpush3.bf16.msra.mxu1 %v2495_v51  ;;  %v2510_v51 = vld [vmem:[#allocation20 + $0x30] sm:$0xff]   ;;  %p2975_p6 = por %p2974_p7, %p2973_p5 }
 0x1c7   : > { %2198 = vmatprep.subr.bf16.mxu1 %v3081_v0 }
 0x1c8   : > { %p2976_p9 = pnand %p2975_p6, %p2969_p8 }
 0x1ca   : > { %2199 = vmatpush3.bf16.msra.mxu1 %v2496_v53  ;;  %v2083_v53 = vld [vmem:[#allocation19] ss:$0 sm:$0xff] }
 0x1cb   : > { %2200 = vmatprep.subr.bf16.mxu1 %v3081_v0 }
 0x1ce   : > { %2201 = vmatpush3.bf16.msra.mxu1 %v2497_v54 }
 0x1cf   : > { %2202 = vmatprep.subr.bf16.mxu1 %v3081_v0 }
 0x1d2   : > { %2203 = vmatpush3.bf16.msra.mxu1 %v2498_v55 }
 0x1d3   : > { %2204 = vmatprep.subr.bf16.mxu1 %v3081_v0 }
 0x1d6   : > { %2205 = vmatpush3.bf16.msra.mxu1 %v2499_v56 }
 0x1d7   : > { %2206 = vmatprep.subr.bf16.mxu1 %v3081_v0 }
 0x1da   : > { %2207 = vmatpush3.bf16.msra.mxu1 %v2500_v57 }
 0x1db   : > { %2208 = vmatprep.subr.bf16.mxu1 %v3081_v0 }
 0x1de   : > { %2209 = vmatpush3.bf16.msra.mxu1 %v2501_v61 }
 0x1df   : > { %2242 = vmatprep.subr.bf16.mxu1 %v3081_v0 }
 0x294   : > { %v838_v10 = vpop.f32.mrb[0].mxu1 }
 0x295   : > { %v839_v11 = vadd.f32 %v2062_v8, %v838_v10  ;;  %v2192_v12 = vpop.f32.mrb[1].mxu1 }
 0x296   : > { %v841_v13 = vpop.f32.mrb[2].mxu1 }
 0x297   : > { %v844_v14 = vmul.f32 %v3660_v9, %v839_v11  ;;  %v2193_v15 = vpop.f32.mrb[3].mxu1  ;;  %v3692_v11 = vsel %vm723_vm7, 1.0, %v3081_v0 }
 0x299   : > { %v846_v16 = vrot.slane %v844_v14, 7 }
 0x29b   : > { %850 = vrot.lane.b32.xlu0 %v846_v16, %s3083_s22  ;;  %v849_v17 = vsel %vm848_vm3, 0.0, %v846_v16 }
 0x29c   : > { %v858_v22 = vmul.f32 %v2066_v18, %v849_v17  ;;  %v868_v25 = vmul.f32 %v2067_v19, %v849_v17 }
 0x30d   : > { %v851_v20 = vpop.permute.xlu0 %850 }
 0x30e   : > { %v853_v21 = vsel %vm848_vm3, 0.0, %v851_v20  ;;  %v2072_v20 = vld [vmem:[#allocation13] ss:$0 sm:$0xff] }
 0x30f   : > { %v863_v23 = vmul.f32 %v2067_v19, %v853_v21  ;;  %v867_v24 = vmul.f32 %v2066_v18, %v853_v21 }
 0x311   : > { %v864_v27 = vsub.f32 %v858_v22, %v863_v23  ;;  %v869_v28 = vadd.f32 %v868_v25, %v867_v24 }
 0x313   : > { %v870_v29 = vmul.f32 %v3668_v26, %v869_v28  ;;  %v865_v33 = vmul.f32 %v3668_v26, %v864_v27 }
 0x315   : > { %872 = vrot.lane.b32.xlu0 %v870_v29, %s3083_s22  ;;  %v866_v34 = vadd.f32 %v865_v33, %v844_v14 }
 0x317   : > { %v877_v35 = vrot.slane %v866_v34, 6 }
 0x319   : > { %v880_v38 = vsel %vm879_vm5, 0.0, %v877_v35  ;;  %v2503_v35 = vld [vmem:[#allocation17 + $0x8] sm:$0xff]  }
 0x31a   : > { %v891_v41 = vmul.f32 %v2068_v36, %v880_v38  ;;  %v901_v44 = vmul.f32 %v2069_v37, %v880_v38 }
 0x387   : > { %v873_v30 = vpop.permute.xlu0 %872 }
 0x388   : > { %v875_v31 = vadd.f32 %v873_v30, %v844_v14 }
 0x38a   : > { %v882_v32 = vrot.slane %v875_v31, 6 }
 0x38c   : > { %883 = vrot.lane.b32.xlu1 %v882_v32, %s3083_s22 }
 0x3fe   : > { %v884_v39 = vpop.permute.xlu1 %883 }
 0x3ff   : > { %v886_v40 = vsel %vm879_vm5, 0.0, %v884_v39  ;;  %v2081_v39 = vld [vmem:[#allocation14] ss:$0 sm:$0xff] }
 0x400   : > { %v896_v42 = vmul.f32 %v2069_v37, %v886_v40  ;;  %v900_v43 = vmul.f32 %v2068_v36, %v886_v40 }
 0x402   : > { %v897_v45 = vsub.f32 %v891_v41, %v896_v42  ;;  %v902_v46 = vadd.f32 %v901_v44, %v900_v43  ;;  %v2082_v41 = vld [vmem:[#allocation16] ss:$0 sm:$0xff]  ;;  %v2504_v44 = vld [vmem:[#allocation20] sm:$0xff]  }
 0x404   : > { %v903_v47 = vmul.f32 %v3660_v9, %v902_v46  ;;  %v898_v58 = vmul.f32 %v3660_v9, %v897_v45  ;;  %v2505_v46 = vld [vmem:[#allocation20 + $0x8] sm:$0xff]  }
 0x406   : > { %905 = vrot.lane.b32.xlu1 %v903_v47, %s3083_s22  ;;  %v899_v59 = vadd.f32 %v898_v58, %v866_v34  ;;  %v2502_v34 = vld [vmem:[#allocation17] sm:$0xff]   ;;  %v2506_v47 = vld [vmem:[#allocation20 + $0x10] sm:$0xff]  }
 0x407   : > { %2215 = vmatpush3.bf16.msra.mxu0 %v2502_v34 }
 0x408   : > { %v910_v60 = vrot.slane %v899_v59, 4  ;;  %2216 = vmatprep.subr.bf16.mxu0 %v3081_v0 }
 0x40a   : > { %v913_v1 = vsel %vm912_vm6, 0.0, %v910_v60 }
 0x40b   : > { %v924_v5 = vmul.f32 %v2070_v62, %v913_v1  ;;  %v934_v10 = vmul.f32 %v2071_v63, %v913_v1  ;;  %2217 = vmatpush3.bf16.msra.mxu0 %v2503_v35  ;;  %v2098_v35 = vld [vmem:[#allocation7 + $0x1] ss:$0 sm:$0xff] }
 0x40c   : > { %2222 = vmatprep.subr.bf16.mxu0 %v3081_v0 }
 0x478   : > { %v906_v49 = vpop.permute.xlu1 %905 }
 0x479   : > { %v908_v50 = vadd.f32 %v906_v49, %v875_v31  ;;  %v2508_v49 = vld [vmem:[#allocation20 + $0x20] sm:$0xff]  }
 0x47b   : > { %v915_v52 = vrot.slane %v908_v50, 4 }
 0x47d   : > { %916 = vrot.lane.b32.xlu0 %v915_v52, %s3083_s22  ;;  %v2511_v52 = vld [vmem:[#allocation20 + $0x38] sm:$0xff]  }
 0x4ef   : > { %v917_v2 = vpop.permute.xlu0 %916 }
 0x4f0   : > { %v919_v4 = vsel %vm912_vm6, 0.0, %v917_v2 }
 0x4f1   : > { %v929_v6 = vmul.f32 %v2071_v63, %v919_v4  ;;  %v933_v8 = vmul.f32 %v2070_v62, %v919_v4 }
 0x4f3   : > { %v930_v12 = vsub.f32 %v924_v5, %v929_v6  ;;  %v935_v13 = vadd.f32 %v934_v10, %v933_v8  ;;  %v2087_v8 = vld [vmem:[#allocation22] ss:$0 sm:$0xff] }
 0x4f5   : > { %v936_v14 = vmul.f32 %v3692_v11, %v935_v13  ;;  %v931_v15 = vmul.f32 %v3692_v11, %v930_v12 }
 0x4f7   : > { %938 = vrot.lane.b32.xlu1 %v936_v14, %s3083_s22  ;;  %v932_v16 = vadd.f32 %v931_v15, %v899_v59 }
 0x569   : > { %v939_v7 = vpop.permute.xlu1 %938 }
 0x56a   : > { %v941_v17 = vadd.f32 %v939_v7, %v908_v50  ;;  %v2509_v50 = vld [vmem:[#allocation20 + $0x28] sm:$0xff]  }
 0x56c   : > { %v943_v18 = vsel %vm942_vm8, %v932_v16, %v941_v17 }
 0x56d   : > { %v944_v19 = vpack.c.bf16 %v943_v18, %v943_v18 }
 0x56f   : > { %2211 = vmatmul.mubr.bf16.vlgmr.msra.gmra.mrb[4].mxu1 %v944_v19 }
 0x570   : > { %2246 = vmatprep.mubr.msk.bf16.mxu1 %vm3082_vm0, %v3081_v0 }
 0x642   : > { %v1033_v21 = vpop.f32.mrb[4].mxu1 }
 0x643   : > { %v1034_v22 = vadd.f32 %v2072_v20, %v1033_v21  ;;  %v2212_v23 = vpop.f32.mrb[5].mxu1 }
 0x644   : > { %v1036_v24 = vpop.f32.mrb[6].mxu1  ;;  %v2513_v23 = vld [vmem:[#allocation5 + $0x18] sm:$0xff]  }
 0x645   : > { %v2213_v25 = vpop.f32.mrb[7].mxu1  ;;  %v1039_v27 = vadd.f32 %v1034_v22, %v3647_v3  ;;  %v2512_v22 = vld [vmem:[#allocation5 + $0x10] sm:$0xff]  }
 0x646   : > { %2243 = vmatpush3.bf16.msra.mxu1 %v2512_v22 }
 0x647   : > { %v1040_v28 = vsel %vm800_vm1, %v1039_v27, 0.0  ;;  %2244 = vmatprep.subr.bf16.mxu1 %v3081_v0 }
 0x648   : > { %1041 = vadd.xlane.f32.xlu0 %v1040_v28 }
 0x64a   : > { %2245 = vmatpush3.bf16.msra.mxu1 %v2513_v23 }
 0x64b   : > { %2250 = vmatprep.subr.bf16.mxu1 %v3081_v0 }
 0x6d5   : > { %v1042_v29 = vpop.xlane.xlu0 %1041 }
 0x6d6   : > { %v1044_v30 = vmul.f32 0.03125, %v1042_v29  ;;  %v2096_v29 = vld [vmem:[#allocation23] ss:$0 sm:$0xff] }
 0x6d8   : > { %v1045_v31 = vsub.f32 %v1039_v27, %v1044_v30 }
 0x6da   : > { %v1046_v32 = vmul.f32 %v1045_v31, %v1045_v31 }
 0x6dc   : > { %v1047_v33 = vsel %vm800_vm1, %v1046_v32, 0.0 }
 0x6dd   : > { %1048 = vadd.xlane.f32.xlu1 %v1047_v33 }
 0x76a   : > { %v1049_v36 = vpop.xlane.xlu1 %1048 }
 0x76b   : > { %v1050_v3 = vmul.f32 0.03125, %v1049_v36 }
 0x76d   : > { %v1051_v37 = vadd.f32 1e-05, %v1050_v3 }
 0x76f   : > { %2532 = vrsqrt.f32 %v1051_v37 }
 0x779   : > { %v2533_v38 = vpop.eup %2532 }
 0x77a   : > { %v1053_v40 = vmul.f32 %v2533_v38, %v1045_v31  ;;  %v2097_v31 = vld [vmem:[#allocation25] ss:$0 sm:$0xff] }
 0x77c   : > { %v1060_v42 = vmul.f32 %v2081_v39, %v1053_v40 }
 0x77e   : > { %v1067_v43 = vadd.f32 %v2082_v41, %v1060_v42  ;;  %v2102_v42 = vld [vmem:[#allocation8 + $0x4] ss:$0 sm:$0xff] }
 0x780   : > { %v1068_v45 = vpack.c.bf16 %v1067_v43, %v1067_v43 }
 0x782   : > { %2219 = vmatmul.mubr.msk.bf16.vlgmr.msra.gmra.mrb[0].mxu0 %vm800_vm1, %v1068_v45 }
 0x783   : > { %2223 = vmatpush3.bf16.msra.mxu0 %v2504_v44  ;;  %2238 = vmatprep.mubr.msk.bf16.mxu0 %vm3082_vm0, %v3081_v0 }
 0x784   : > { %2224 = vmatprep.subr.bf16.mxu0 %v3081_v0 }
 0x787   : > { %2225 = vmatpush3.bf16.msra.mxu0 %v2505_v46 }
 0x788   : > { %2226 = vmatprep.subr.bf16.mxu0 %v3081_v0 }
 0x78b   : > { %2227 = vmatpush3.bf16.msra.mxu0 %v2506_v47 }
 0x78c   : > { %2228 = vmatprep.subr.bf16.mxu0 %v3081_v0 }
 0x78f   : > { %2229 = vmatpush3.bf16.msra.mxu0 %v2507_v48 }
 0x790   : > { %2230 = vmatprep.subr.bf16.mxu0 %v3081_v0 }
 0x793   : > { %2231 = vmatpush3.bf16.msra.mxu0 %v2508_v49 }
 0x794   : > { %2232 = vmatprep.subr.bf16.mxu0 %v3081_v0 }
 0x797   : > { %2233 = vmatpush3.bf16.msra.mxu0 %v2509_v50 }
 0x798   : > { %2234 = vmatprep.subr.bf16.mxu0 %v3081_v0 }
 0x79b   : > { %2235 = vmatpush3.bf16.msra.mxu0 %v2510_v51 }
 0x79c   : > { %2236 = vmatprep.subr.bf16.mxu0 %v3081_v0 }
 0x79f   : > { %2237 = vmatpush3.bf16.msra.mxu0 %v2511_v52 }
 0x7a0   : > { %2270 = vmatprep.subr.bf16.mxu0 %v3081_v0 }
 0x855   : > { %v1124_v54 = vpop.f32.mrb[0].mxu0 }
 0x856   : > { %v1125_v55 = vadd.f32 %v2083_v53, %v1124_v54  ;;  %v2220_v56 = vpop.f32.mrb[1].mxu0 }
 0x857   : > { %v1127_v57 = vpop.f32.mrb[2].mxu0 }
 0x858   : > { %v1131_v58 = vmul.f32 0.044715, %v1125_v55  ;;  %v2221_v59 = vpop.f32.mrb[3].mxu0  ;;  %v1130_v2 = vmul.f32 0.5, %v1125_v55 }
 0x85a   : > { %v1132_v60 = vmul.f32 %v1131_v58, %v1125_v55 }
 0x85c   : > { %v1133_v61 = vmul.f32 %v1132_v60, %v1125_v55  ;;  %v2104_v60 = vld [vmem:[#allocation8 + $0x5] ss:$0 sm:$0xff] }
 0x85e   : > { %v1134_v62 = vadd.f32 %v1133_v61, %v1125_v55  ;;  %v2105_v61 = vld [vmem:[#allocation10 + $0x5] ss:$0 sm:$0xff] }
 0x860   : > { %v1135_v63 = vmul.f32 0.7978846, %v1134_v62 }
 0x862   : > { %2534 = vtanh.f32 %v1135_v63 }
 0x86c   : > { %v2535_v1 = vpop.eup %2534 }
 0x86d   : > { %v1137_v4 = vadd.f32 1.0, %v2535_v1 }
 0x86f   : > { %v1138_v5 = vmul.f32 %v1137_v4, %v1130_v2 }
 0x871   : > { %v1139_v6 = vpack.c.bf16 %v1138_v5, %v1138_v5 }
 0x873   : > { %2239 = vmatmul.mubr.bf16.vlgmr.msra.gmra.mrb[4].mxu0 %v1139_v6 }
 0x874   : > { %2274 = vmatprep.mubr.msk.bf16.mxu0 %vm3082_vm0, %v3081_v0 }
 0x946   : > { %v1228_v10 = vpop.f32.mrb[4].mxu0 }
 0x947   : > { %v1229_v12 = vadd.f32 %v2087_v8, %v1228_v10  ;;  %v2240_v13 = vpop.f32.mrb[5].mxu0 }
 0x948   : > { %v1231_v14 = vpop.f32.mrb[6].mxu0 }
 0x949   : > { %v2241_v15 = vpop.f32.mrb[7].mxu0  ;;  %v1234_v7 = vadd.f32 %v1229_v12, %v1067_v43  ;;  %v2103_v43 = vld [vmem:[#allocation10 + $0x4] ss:$0 sm:$0xff] }
 0x94a   : > { %v2515_v15 = vld [vmem:[#allocation11 + $0x48] sm:$0xff]  }
 0x94b   : > { %v1235_v16 = vsel %vm800_vm1, %v1234_v7, 0.0 }
 0x94c   : > { %1236 = vadd.xlane.f32.xlu0 %v1235_v16  ;;  %v2516_v16 = vld [vmem:[#allocation11 + $0x50] sm:$0xff]  }
 0x9d9   : > { %v1237_v17 = vpop.xlane.xlu0 %1236 }
 0x9da   : > { %v1238_v18 = vmul.f32 0.03125, %v1237_v17  ;;  %v2517_v17 = vld [vmem:[#allocation11 + $0x58] sm:$0xff]  }
 0x9dc   : > { %v1239_v19 = vsub.f32 %v1234_v7, %v1238_v18  ;;  %v2518_v18 = vld [vmem:[#allocation11 + $0x60] sm:$0xff]  }
 0x9de   : > { %v1240_v20 = vmul.f32 %v1239_v19, %v1239_v19 }
 0x9e0   : > { %v1241_v21 = vsel %vm800_vm1, %v1240_v20, 0.0  ;;  %v2520_v20 = vld [vmem:[#allocation11 + $0x70] sm:$0xff]  }
 0x9e1   : > { %1242 = vadd.xlane.f32.xlu0 %v1241_v21 }
 0xa6e   : > { %v1243_v24 = vpop.xlane.xlu0 %1242 }
 0xa6f   : > { %v1244_v25 = vmul.f32 0.03125, %v1243_v24  ;;  %v2521_v24 = vld [vmem:[#allocation11 + $0x78] sm:$0xff]  }
 0xa71   : > { %v1245_v27 = vadd.f32 1e-05, %v1244_v25  ;;  %v2106_v25 = vld [vmem:[#allocation8 + $0x6] ss:$0 sm:$0xff] }
 0xa73   : > { %2536 = vrsqrt.f32 %v1245_v27  ;;  %v2107_v27 = vld [vmem:[#allocation10 + $0x6] ss:$0 sm:$0xff] }
 0xa7d   : > { %v2537_v28 = vpop.eup %2536 }
 0xa7e   : > { %v1247_v30 = vmul.f32 %v2537_v28, %v1239_v19  ;;  %v2519_v19 = vld [vmem:[#allocation11 + $0x68] sm:$0xff]  }
 0xa80   : > { %v1254_v32 = vmul.f32 %v2096_v29, %v1247_v30 }
 0xa82   : > { %v3722_v33 = vadd.f32 %v2097_v31, %v1254_v32 }
 0xa84   : > { %v1330_v34 = vpack.c.bf16 %v3722_v33, %v3722_v33 }
 0xa86   : > { %2247 = vmatmul.mubr.msk.bf16.vlgmr.msra.gmra.mrb[8].mxu1 %vm800_vm1, %v1330_v34 }
 0xa87   : > { %2266 = vmatprep.mubr.msk.bf16.mxu1 %vm3082_vm0, %v3081_v0 }
 0xb59   : > { %v1386_v36 = vpop.f32.mrb[8].mxu1 }
 0xb5a   : > { %v1387_v3 = vadd.f32 %v2098_v35, %v1386_v36  ;;  %v2248_v37 = vpop.f32.mrb[9].mxu1 }
 0xb5b   : > { %v1389_v38 = vpop.f32.mrb[10].mxu1 }
 0xb5c   : > { %v1392_v39 = vmul.f32 %v3660_v9, %v1387_v3  ;;  %v2249_v40 = vpop.f32.mrb[11].mxu1 }
 0xb5e   : > { %v1394_v41 = vrot.slane %v1392_v39, 7 }
 0xb60   : > { %1397 = vrot.lane.b32.xlu1 %v1394_v41, %s3083_s22  ;;  %v1396_v44 = vsel %vm848_vm3, 0.0, %v1394_v41 }
 0xb61   : > { %v1405_v47 = vmul.f32 %v2102_v42, %v1396_v44  ;;  %v1415_v50 = vmul.f32 %v2103_v43, %v1396_v44 }
 0xbd2   : > { %v1398_v45 = vpop.permute.xlu1 %1397 }
 0xbd3   : > { %v1400_v46 = vsel %vm848_vm3, 0.0, %v1398_v45 }
 0xbd4   : > { %v1410_v48 = vmul.f32 %v2103_v43, %v1400_v46  ;;  %v1414_v49 = vmul.f32 %v2102_v42, %v1400_v46  ;;  %v2108_v43 = vld [vmem:[#allocation13 + $0x1] ss:$0 sm:$0xff] }
 0xbd6   : > { %v1411_v51 = vsub.f32 %v1405_v47, %v1410_v48  ;;  %v1416_v52 = vadd.f32 %v1415_v50, %v1414_v49 }
 0xbd8   : > { %v1417_v53 = vmul.f32 %v3668_v26, %v1416_v52  ;;  %v1412_v57 = vmul.f32 %v3668_v26, %v1411_v51  ;;  %v2514_v26 = vld [vmem:[#allocation11 + $0x40] sm:$0xff]  }
 0xbd9   : > { %2251 = vmatpush3.bf16.msra.mxu1 %v2514_v26  ;;  %v2530_v26 = vld [vmem:[#allocation20 + $0x70] sm:$0xff]  }
 0xbda   : > { %1419 = vrot.lane.b32.xlu0 %v1417_v53, %s3083_s22  ;;  %v1413_v58 = vadd.f32 %v1412_v57, %v1392_v39  ;;  %2252 = vmatprep.subr.bf16.mxu1 %v3081_v0 }
 0xbdc   : > { %v1424_v59 = vrot.slane %v1413_v58, 6 }
 0xbdd   : > { %2253 = vmatpush3.bf16.msra.mxu1 %v2515_v15 }
 0xbde   : > { %v1426_v62 = vsel %vm879_vm5, 0.0, %v1424_v59  ;;  %2254 = vmatprep.subr.bf16.mxu1 %v3081_v0 }
 0xbdf   : > { %v1437_v2 = vmul.f32 %v2104_v60, %v1426_v62  ;;  %v1447_v6 = vmul.f32 %v2105_v61, %v1426_v62  ;;  %v2118_v62 = vld [vmem:[#allocation16 + $0x1] ss:$0 sm:$0xff] }
 0xbe1   : > { %2255 = vmatpush3.bf16.msra.mxu1 %v2516_v16 }
 0xbe2   : > { %2256 = vmatprep.subr.bf16.mxu1 %v3081_v0 }
 0xbe5   : > { %2257 = vmatpush3.bf16.msra.mxu1 %v2517_v17 }
 0xbe6   : > { %2258 = vmatprep.subr.bf16.mxu1 %v3081_v0 }
 0xbe9   : > { %2259 = vmatpush3.bf16.msra.mxu1 %v2518_v18 }
 0xbea   : > { %2260 = vmatprep.subr.bf16.mxu1 %v3081_v0 }
 0xbed   : > { %2261 = vmatpush3.bf16.msra.mxu1 %v2519_v19 }
 0xbee   : > { %2262 = vmatprep.subr.bf16.mxu1 %v3081_v0 }
 0xbf1   : > { %2263 = vmatpush3.bf16.msra.mxu1 %v2520_v20 }
 0xbf2   : > { %2264 = vmatprep.subr.bf16.mxu1 %v3081_v0 }
 0xbf5   : > { %2265 = vmatpush3.bf16.msra.mxu1 %v2521_v24 }
 0xc4c   : > { %v1420_v54 = vpop.permute.xlu0 %1419 }
 0xc4d   : > { %v1422_v55 = vadd.f32 %v1420_v54, %v1392_v39 }
 0xc4f   : > { %v1428_v56 = vrot.slane %v1422_v55, 6 }
 0xc51   : > { %1429 = vrot.lane.b32.xlu1 %v1428_v56, %s3083_s22  ;;  %v2523_v56 = vld [vmem:[#allocation17 + $0x18] sm:$0xff]  }
 0xcc3   : > { %v1430_v63 = vpop.permute.xlu1 %1429 }
 0xcc4   : > { %v1432_v1 = vsel %vm879_vm5, 0.0, %v1430_v63 }
 0xcc5   : > { %v1442_v4 = vmul.f32 %v2105_v61, %v1432_v1  ;;  %v1446_v5 = vmul.f32 %v2104_v60, %v1432_v1  ;;  %v2117_v60 = vld [vmem:[#allocation14 + $0x1] ss:$0 sm:$0xff] }
 0xcc7   : > { %v1443_v8 = vsub.f32 %v1437_v2, %v1442_v4  ;;  %v1448_v10 = vadd.f32 %v1447_v6, %v1446_v5  ;;  %v2524_v2 = vld [vmem:[#allocation20 + $0x40] sm:$0xff]   ;;  %v2525_v5 = vld [vmem:[#allocation20 + $0x48] sm:$0xff]   ;;  %v2526_v6 = vld [vmem:[#allocation20 + $0x50] sm:$0xff]  }
 0xcc9   : > { %v1449_v12 = vmul.f32 %v3660_v9, %v1448_v10  ;;  %v1444_v21 = vmul.f32 %v3660_v9, %v1443_v8  ;;  %v2527_v8 = vld [vmem:[#allocation20 + $0x58] sm:$0xff]   ;;  %v2528_v10 = vld [vmem:[#allocation20 + $0x60] sm:$0xff]  }
 0xccb   : > { %1451 = vrot.lane.b32.xlu1 %v1449_v12, %s3083_s22  ;;  %v1445_v22 = vadd.f32 %v1444_v21, %v1413_v58  ;;  %v2529_v12 = vld [vmem:[#allocation20 + $0x68] sm:$0xff]  }
 0xccd   : > { %v1456_v23 = vrot.slane %v1445_v22, 4 }
 0xccf   : > { %v1458_v28 = vsel %vm912_vm6, 0.0, %v1456_v23 }
 0xcd0   : > { %v1469_v31 = vmul.f32 %v2106_v25, %v1458_v28  ;;  %v1479_v35 = vmul.f32 %v2107_v27, %v1458_v28 }
 0xd3d   : > { %v1452_v13 = vpop.permute.xlu1 %1451 }
 0xd3e   : > { %v1454_v14 = vadd.f32 %v1452_v13, %v1422_v55  ;;  %v2522_v55 = vld [vmem:[#allocation17 + $0x10] sm:$0xff]   ;;  %v2531_v13 = vld [vmem:[#allocation20 + $0x78] sm:$0xff]  }
 0xd3f   : > { %2271 = vmatpush3.bf16.msra.mxu0 %v2522_v55 }
 0xd40   : > { %v1460_v7 = vrot.slane %v1454_v14, 4  ;;  %2272 = vmatprep.subr.bf16.mxu0 %v3081_v0 }
 0xd42   : > { %1461 = vrot.lane.b32.xlu0 %v1460_v7, %s3083_s22 }
 0xd43   : > { %2273 = vmatpush3.bf16.msra.mxu0 %v2523_v56 }
 0xd44   : > { %2278 = vmatprep.subr.bf16.mxu0 %v3081_v0 }
 0xdb4   : > { %v1462_v29 = vpop.permute.xlu0 %1461 }
 0xdb5   : > { %v1464_v30 = vsel %vm912_vm6, 0.0, %v1462_v29 }
 0xdb6   : > { %v1474_v32 = vmul.f32 %v2107_v27, %v1464_v30  ;;  %v1478_v34 = vmul.f32 %v2106_v25, %v1464_v30 }
 0xdb8   : > { %v1475_v36 = vsub.f32 %v1469_v31, %v1474_v32  ;;  %v1480_v3 = vadd.f32 %v1479_v35, %v1478_v34 }
 0xdba   : > { %v1481_v37 = vmul.f32 %v3692_v11, %v1480_v3  ;;  %v1476_v9 = vmul.f32 %v3692_v11, %v1475_v36 }
 0xdbc   : > { %1483 = vrot.lane.b32.xlu1 %v1481_v37, %s3083_s22  ;;  %v1477_v39 = vadd.f32 %v1476_v9, %v1445_v22 }
 0xe2e   : > { %v1484_v38 = vpop.permute.xlu1 %1483 }
 0xe2f   : > { %v1486_v40 = vadd.f32 %v1484_v38, %v1454_v14  ;;  %v2119_v14 = vld [vmem:[#allocation19 + $0x1] ss:$0 sm:$0xff] }
 0xe31   : > { %v1487_v41 = vsel %vm942_vm8, %v1477_v39, %v1486_v40 }
 0xe32   : > { %v1488_v42 = vpack.c.bf16 %v1487_v41, %v1487_v41 }
 0xe34   : > { %2267 = vmatmul.mubr.bf16.vlgmr.msra.gmra.mrb[12].mxu1 %v1488_v42 }
 0xf07   : > { %v1577_v44 = vpop.f32.mrb[12].mxu1 }
 0xf08   : > { %v1578_v45 = vadd.f32 %v2108_v43, %v1577_v44  ;;  %v2268_v46 = vpop.f32.mrb[13].mxu1 }
 0xf09   : > { %v1580_v47 = vpop.f32.mrb[14].mxu1 }
 0xf0a   : > { %v2269_v48 = vpop.f32.mrb[15].mxu1  ;;  %v1583_v49 = vadd.f32 %v1578_v45, %v3722_v33  ;;  %v2132_v45 = vld [vmem:[#allocation23 + $0x1] ss:$0 sm:$0xff]  ;;  %v2133_v47 = vld [vmem:[#allocation25 + $0x1] ss:$0 sm:$0xff] }
 0xf0c   : > { %v1584_v50 = vsel %vm800_vm1, %v1583_v49, 0.0 }
 0xf0d   : > { %1585 = vadd.xlane.f32.xlu0 %v1584_v50 }
 0xf9a   : > { %v1586_v51 = vpop.xlane.xlu0 %1585 }
 0xf9b   : > { %v1587_v11 = vmul.f32 0.03125, %v1586_v51 }
 0xf9d   : > { %v1588_v52 = vsub.f32 %v1583_v49, %v1587_v11 }
 0xf9f   : > { %v1589_v53 = vmul.f32 %v1588_v52, %v1588_v52 }
 0xfa1   : > { %v1590_v54 = vsel %vm800_vm1, %v1589_v53, 0.0 }
 0xfa2   : > { %1591 = vadd.xlane.f32.xlu1 %v1590_v54 }
0x102f   : > { %v1592_v57 = vpop.xlane.xlu1 %1591 }
0x1030   : > { %v1593_v33 = vmul.f32 0.03125, %v1592_v57 }
0x1032   : > { %v1594_v58 = vadd.f32 1e-05, %v1593_v33 }
0x1034   : > { %2538 = vrsqrt.f32 %v1594_v58 }
0x103e   : > { %v2539_v59 = vpop.eup %2538 }
0x103f   : > { %v1596_v61 = vmul.f32 %v2539_v59, %v1588_v52 }
0x1041   : > { %v1603_v63 = vmul.f32 %v2117_v60, %v1596_v61 }
0x1043   : > { %v1610_v1 = vadd.f32 %v2118_v62, %v1603_v63 }
0x1045   : > { %v1611_v4 = vpack.c.bf16 %v1610_v1, %v1610_v1 }
0x1047   : > { %2275 = vmatmul.mubr.msk.bf16.vlgmr.msra.gmra.mrb[8].mxu0 %vm800_vm1, %v1611_v4 }
0x1048   : > { %2279 = vmatpush3.bf16.msra.mxu0 %v2524_v2  ;;  %2294 = vmatprep.mubr.msk.bf16.mxu0 %vm3082_vm0, %v3081_v0 }
0x1049   : > { %2280 = vmatprep.subr.bf16.mxu0 %v3081_v0 }
0x104c   : > { %2281 = vmatpush3.bf16.msra.mxu0 %v2525_v5 }
0x104d   : > { %2282 = vmatprep.subr.bf16.mxu0 %v3081_v0 }
0x1050   : > { %2283 = vmatpush3.bf16.msra.mxu0 %v2526_v6 }
0x1051   : > { %2284 = vmatprep.subr.bf16.mxu0 %v3081_v0 }
0x1054   : > { %2285 = vmatpush3.bf16.msra.mxu0 %v2527_v8 }
0x1055   : > { %2286 = vmatprep.subr.bf16.mxu0 %v3081_v0 }
0x1058   : > { %2287 = vmatpush3.bf16.msra.mxu0 %v2528_v10 }
0x1059   : > { %2288 = vmatprep.subr.bf16.mxu0 %v3081_v0 }
0x105c   : > { %2289 = vmatpush3.bf16.msra.mxu0 %v2529_v12 }
0x105d   : > { %2290 = vmatprep.subr.bf16.mxu0 %v3081_v0 }
0x1060   : > { %2291 = vmatpush3.bf16.msra.mxu0 %v2530_v26 }
0x1061   : > { %2292 = vmatprep.subr.bf16.mxu0 %v3081_v0  ;;  %v2123_v0 = vld [vmem:[#allocation22 + $0x1] ss:$0 sm:$0xff] }
0x1064   : > { %2293 = vmatpush3.bf16.msra.mxu0 %v2531_v13 }
0x111a   : > { %v1667_v15 = vpop.f32.mrb[8].mxu0 }
0x111b   : > { %v1668_v7 = vadd.f32 %v2119_v14, %v1667_v15  ;;  %v2276_v16 = vpop.f32.mrb[9].mxu0 }
0x111c   : > { %v1670_v17 = vpop.f32.mrb[10].mxu0 }
0x111d   : > { %v1674_v18 = vmul.f32 0.044715, %v1668_v7  ;;  %v2277_v19 = vpop.f32.mrb[11].mxu0  ;;  %v1673_v25 = vmul.f32 0.5, %v1668_v7 }
0x111f   : > { %v1675_v20 = vmul.f32 %v1674_v18, %v1668_v7 }
0x1121   : > { %v1676_v21 = vmul.f32 %v1675_v20, %v1668_v7 }
0x1123   : > { %v1677_v22 = vadd.f32 %v1676_v21, %v1668_v7 }
0x1125   : > { %v1678_v23 = vmul.f32 0.7978846, %v1677_v22 }
0x1127   : > { %2540 = vtanh.f32 %v1678_v23 }
0x1131   : > { %v2541_v24 = vpop.eup %2540 }
0x1132   : > { %v1680_v27 = vadd.f32 1.0, %v2541_v24 }
0x1134   : > { %v1681_v28 = vmul.f32 %v1680_v27, %v1673_v25 }
0x1136   : > { %v1682_v29 = vpack.c.bf16 %v1681_v28, %v1681_v28 }
0x1138   : > { %2295 = vmatmul.mubr.bf16.vlgmr.msra.gmra.mrb[12].mxu0 %v1682_v29 }
0x120b   : > { %v1771_v30 = vpop.f32.mrb[12].mxu0 }
0x120c   : > { %v1772_v31 = vadd.f32 %v2123_v0, %v1771_v30  ;;  %v2296_v32 = vpop.f32.mrb[13].mxu0 }
0x120d   : > { %v1774_v34 = vpop.f32.mrb[14].mxu0 }
0x120e   : > { %v2297_v35 = vpop.f32.mrb[15].mxu0  ;;  %v1777_v36 = vadd.f32 %v1772_v31, %v1610_v1 }
0x1210   : > { %v1778_v3 = vsel %vm800_vm1, %v1777_v36, 0.0 }
0x1211   : > { %1779 = vadd.xlane.f32.xlu0 %v1778_v3 }
0x129e   : > { %v1780_v37 = vpop.xlane.xlu0 %1779 }
0x129f   : > { %v1781_v9 = vmul.f32 0.03125, %v1780_v37 }
0x12a1   : > { %v1782_v38 = vsub.f32 %v1777_v36, %v1781_v9 }
0x12a3   : > { %v1783_v39 = vmul.f32 %v1782_v38, %v1782_v38 }
0x12a5   : > { %v1784_v40 = vsel %vm800_vm1, %v1783_v39, 0.0 }
0x12a6   : > { %1785 = vadd.xlane.f32.xlu0 %v1784_v40 }
0x1333   : > { %v1786_v41 = vpop.xlane.xlu0 %1785 }
0x1334   : > { %v1787_v42 = vmul.f32 0.03125, %v1786_v41 }
0x1336   : > { %v1788_v43 = vadd.f32 1e-05, %v1787_v42 }
0x1338   : > { %2542 = vrsqrt.f32 %v1788_v43 }
0x1342   : > { %v2543_v44 = vpop.eup %2542 }
0x1343   : > { %v1790_v46 = vmul.f32 %v2543_v44, %v1782_v38 }
0x1345   : > { %v1797_v48 = vmul.f32 %v2132_v45, %v1790_v46 }
0x1347   : > { %v1804_v49 = vadd.f32 %v2133_v47, %v1797_v48 }
0x1349   : > { %1805 = vst.msk [vmem:[%s712_s28] sm:$0xff] %vm800_vm1, %v1804_v49 }
0x134a   : > { %2979 = shalt.err (!%p2976_p9)
}
0x134b   : > { %s2980_s3 = scalar_lea.hbm %s3779_s24, 128  ;;  %s2984_s28 = scalar_lea.hbm %s3907_s17, 256 }
0x134c   : > { %p2981_p12 = scmp.ne.s32.totalorder %s3779_s24, %s2980_s3  ;;  %p2985_p0 = scmp.lt.u32.totalorder %s3779_s24, %s3907_s17 }
0x134d   : > { %p2986_p2 = scmp.lt.u32.totalorder %s2984_s28, %s2980_s3  ;;  %p2988_p4 = scmp.lt.u32.totalorder %s2980_s3, %s3779_s24 }
0x134e   : > { %p2982_p1 = pnand %p2981_p12, %p3908_p10 }
0x134f   : > { %p2987_p3 = por %p2986_p2, %p2985_p0 }
0x1350   : > { %p2983_p13 = pneg %p2982_p1 }
0x1351   : > { %p2989_p11 = por %p2988_p4, %p2987_p3 }
0x1353   : > { %p2990_p8 = pnand %p2989_p11, %p2983_p13 }
0x1355   : > { %2993 = shalt.err (!%p2990_p8)
}
0x1356   : > { %2356 = dma.vmem_to_hbm [thread:$0]  (%p3908_p10), %s3781_s20, 128, %s3779_s24, %s1807_s15  }
0x1357 PF: > { %s3909_s0 = sld [smem:[#allocation36_spill]]  ;;  %p3910_p5 = scmp.ne.s32.totalorder %s3885_s2, 0 }
0x1358   : > { %p3911_p7 = scmp.ge.s32.totalorder %s3060_s21, 2 }
0x135a   : > { %p2406_p6 = pnand %p3911_p7, %p3910_p5 }
0x135d   : > { %s1832_s25 = sand.u32 1, %s3909_s0  }
0x135e   : > { %s1833_s16 = scalar_lea.sflag [#allocation4], %s1832_s25 }
0x135f   : > { %3043 = dma.done.wait (!%p2406_p6), %s1833_s16, 128  }
0x1360   : > { %3045 = vsyncadd (!%p2406_p6), %s1833_s16, 4294967168  ;;  %s3912_s27 = sld [smem:[#allocation37_spill]]  ;;  %s3913_s19 = sld [smem:[#allocation38_spill]] }
0x1361   : > { %s3914_s3 = smov %s3538_s18  ;;  %p35_p9 = scmp.ge.s32.totalorder %s3527_s1, 4  }
0x1362   : > { %s3916_s20 = smov %s3914_s3  ;;  %s3917_s21 = smov %s3527_s1 }
0x1363   :  { %37 = sbr.rel (!%p35_p9) target bundleno = 18 (0x12), region = 195 }
0x1366   : > { %s3915_s18 = smov %s3912_s27 }
0x136a   :  { %1838 = vsyncpa [#allocation3], 1 }
0x136b   :  { %1840 = vsyncpa [#allocation3 + $0x1], 1 }
0x136c   :  { %1841 = vsyncpa [#allocation6], 1 }
0x136d   :  { %1842 = vsyncpa [#allocation9], 1 }
0x136e   :  { %1843 = vsyncpa [#allocation12], 1 }
0x136f   :  { %1844 = vsyncpa [#allocation15], 1 }
0x1370   :  { %1845 = vsyncpa [#allocation18], 1 }
0x1371   :  { %1846 = vsyncpa [#allocation21], 1 }
0x1372   :  { %1847 = vsyncpa [#allocation24], 1 }
0x1373   :  { %1848 = vsyncpa [#allocation4], 1 }
0x1374   :  { %1850 = vsyncpa [#allocation4 + $0x1], 1 }

</bundles_post_ra>
